<compile_context>
chip_gen: v5e
topology: v5e:2x2
jax: 0.10.0
libtpu: 0.0.40
codegen_flags: <defaults>
</compile_context>

<pallas_src>
import functools

import jax
import jax.numpy as jnp
from jax.experimental import pallas as pl
from jax.experimental.pallas import tpu as pltpu

# ---------------- problem sizes (small, consistent with the module) ----------------
B = 8          # batch
E = 32         # embedding_dim
H = 64         # hidden_dim
I = 16         # input_dim (output feature dim of cell2)
STEP = 8       # step
assert E < I * STEP  # same assert as the PyTorch module


# ---------------------------------- Pallas kernel ----------------------------------
def lstm_decoder_kernel(x_ref, wih1_ref, w1_ref, whh2_ref, b1_ref, b2_ref, out_ref,
                        *, step, hidden_dim, input_dim):
    """Two-cell LSTM recurrence, fully unrolled, state carried in vregs.

    x_ref    : (B, E)          embedding (identical input every step)
    wih1_ref : (E, 4H)         W_ih of cell1, gate-permuted (f,i,o,g), transposed
    w1_ref   : (H, 4I+4H)      fused [wih2^T | whh1^T]  (pre2 columns FIRST)
    whh2_ref : (I, 4I)         W_hh of cell2, gate-permuted, transposed
    b1_ref   : (1, 4H)         b_ih + b_hh of cell1 (gate-permuted)
    b2_ref   : (1, 4I)         b_ih + b_hh of cell2 (gate-permuted)
    out_ref  : (B, STEP*I)     lane-dense output (reshaped to (B, STEP, I) outside)
    """
    Hd, Id = hidden_dim, input_dim
    G1, G2 = 4 * Hd, 4 * Id
    Bn = x_ref.shape[0]

    # Loop-invariant loads / projections (hoisted out of the recurrence).
    x_gates = jnp.dot(x_ref[...], wih1_ref[...],
                      preferred_element_type=jnp.float32) + b1_ref[...]
    w1 = w1_ref[...]                                   # (H, 4I+4H)
    whh2 = whh2_ref[...]                               # (I, 4I)
    b2b = jnp.broadcast_to(b2_ref[...], (Bn, G2))      # hoisted broadcast

    def lstm_gates(pre, c_prev, n):
        # Gate column order is (f, i, o, g) — permuted in the wrapper so f aligns
        # with c_prev and o with tanh(c_new).  One full-width sigmoid (EUP) + one
        # tanh on the g slice.
        s = jax.nn.sigmoid(pre)
        f_g = s[:, 0 * n:1 * n]
        i_g = s[:, 1 * n:2 * n]
        o_g = s[:, 2 * n:3 * n]
        g_g = jnp.tanh(pre[:, 3 * n:4 * n])
        c_new = f_g * c_prev + i_g * g_g
        h_new = o_g * jnp.tanh(c_new)
        return h_new, c_new

    # Zero-init states (init_hidden_state in the PyTorch module); carried in vregs.
    carry1 = jnp.zeros((Bn, G1), jnp.float32)   # h0_prev @ whh1^T contribution
    c0 = jnp.zeros((Bn, Hd), jnp.float32)
    h1 = jnp.zeros((Bn, Id), jnp.float32)
    c1 = jnp.zeros((Bn, Id), jnp.float32)

    for t in range(step):  # fully unrolled: LLO sees the whole dependency chain
        # Uses only last step's h1 -> issued at the top of the step so the MXU work
        # overlaps cell1's EUP/VPU gate math (off the critical path).
        pre2_rec = jnp.dot(h1, whh2, preferred_element_type=jnp.float32)

        # ---- cell1: input = embedding projection + recurrent carry, size H ----
        pre1 = x_gates + carry1
        h0, c0 = lstm_gates(pre1, c0, Hd)

        # ---- single h0 matmul; pre2 columns first (consumed now), carry last ----
        z = jnp.dot(h0, w1, preferred_element_type=jnp.float32)
        pre2 = z[:, :G2] + pre2_rec + b2b      # = h0@wih2^T + h1_prev@whh2^T + b2
        carry1 = z[:, G2:]                     # = h0@whh1^T   (used next step)

        # ---- cell2: state (h1, c1), size I ----
        h1, c1 = lstm_gates(pre2, c1, Id)

        # Per-step masked store into the (8, 128) lane-dense output slab.
        out_ref[:, t * Id:(t + 1) * Id] = h1


# ------------------------------------ wrapper ---------------------------------------
def _permute_gate_rows(w, n):
    """Reorder 4 gate blocks along axis 0 from PyTorch (i, f, g, o) to (f, i, o, g)."""
    return jnp.concatenate([w[1 * n:2 * n], w[0 * n:1 * n],
                            w[3 * n:4 * n], w[2 * n:3 * n]], axis=0)


def lstm_decoder(emb_inp, params):
    """emb_inp: (B, E) float32  ->  (B, STEP, I) float32"""
    (w_ih1, w_hh1, b_ih1, b_hh1, w_ih2, w_hh2, b_ih2, b_hh2) = params

    # Gate-permute (f,i,o,g), transpose, fuse biases — plain-JAX glue.
    wih1_t = _permute_gate_rows(w_ih1, H).T                       # (E, 4H)
    whh1_t = _permute_gate_rows(w_hh1, H).T                       # (H, 4H)
    wih2_t = _permute_gate_rows(w_ih2, I).T                       # (H, 4I)
    whh2_t = _permute_gate_rows(w_hh2, I).T                       # (I, 4I)
    b1 = _permute_gate_rows(b_ih1 + b_hh1, H).reshape(1, 4 * H)   # (1, 4H)
    b2 = _permute_gate_rows(b_ih2 + b_hh2, I).reshape(1, 4 * I)   # (1, 4I)

    # Fused h0 weight: pre2 (4I) columns FIRST, carry (4H) columns last.
    w1 = jnp.concatenate([wih2_t, whh1_t], axis=1)                # (H, 4I+4H) = (64, 320)

    kernel = functools.partial(lstm_decoder_kernel,
                               step=STEP, hidden_dim=H, input_dim=I)

    vmem = pl.BlockSpec(memory_space=pltpu.MemorySpace.VMEM)
    out = pl.pallas_call(
        kernel,
        out_shape=jax.ShapeDtypeStruct((B, STEP * I), jnp.float32),
        in_specs=[vmem] * 6,
        out_specs=vmem,
    )(emb_inp, wih1_t, w1, whh2_t, b1, b2)

    # Lane-dense (B, STEP*I) -> (B, STEP, I): pure reshape, no transpose needed.
    return out.reshape(B, STEP, I)


# --------------------------- pure-JAX reference (for checking) -----------------------
def lstm_decoder_ref(emb_inp, params):
    (w_ih1, w_hh1, b_ih1, b_hh1, w_ih2, w_hh2, b_ih2, b_hh2) = params

    def cell(x, h, c, w_ih, w_hh, b_ih, b_hh, n):
        pre = x @ w_ih.T + b_ih + h @ w_hh.T + b_hh
        i_g = jax.nn.sigmoid(pre[:, 0 * n:1 * n])
        f_g = jax.nn.sigmoid(pre[:, 1 * n:2 * n])
        g_g = jnp.tanh(pre[:, 2 * n:3 * n])
        o_g = jax.nn.sigmoid(pre[:, 3 * n:4 * n])
        c_new = f_g * c + i_g * g_g
        h_new = o_g * jnp.tanh(c_new)
        return h_new, c_new

    h0 = jnp.zeros((B, H), jnp.float32)
    c0 = jnp.zeros((B, H), jnp.float32)
    h1 = jnp.zeros((B, I), jnp.float32)
    c1 = jnp.zeros((B, I), jnp.float32)
    outs = []
    for _ in range(STEP):
        h0, c0 = cell(emb_inp, h0, c0, w_ih1, w_hh1, b_ih1, b_hh1, H)
        h1, c1 = cell(h0, h1, c1, w_ih2, w_hh2, b_ih2, b_hh2, I)
        outs.append(h1)
    return jnp.transpose(jnp.stack(outs), (1, 0, 2))


# ------------------------------------- main ------------------------------------------
if __name__ == "__main__":
    key = jax.random.PRNGKey(0)
    ks = jax.random.split(key, 9)

    # deterministic parameter init, PyTorch LSTMCell-style uniform(-k, k)
    k1 = 1.0 / jnp.sqrt(H)
    k2 = 1.0 / jnp.sqrt(I)
    params = (
        jax.random.uniform(ks[0], (4 * H, E), jnp.float32, -k1, k1),   # w_ih1
        jax.random.uniform(ks[1], (4 * H, H), jnp.float32, -k1, k1),   # w_hh1
        jax.random.uniform(ks[2], (4 * H,), jnp.float32, -k1, k1),     # b_ih1
        jax.random.uniform(ks[3], (4 * H,), jnp.float32, -k1, k1),     # b_hh1
        jax.random.uniform(ks[4], (4 * I, H), jnp.float32, -k2, k2),   # w_ih2
        jax.random.uniform(ks[5], (4 * I, I), jnp.float32, -k2, k2),   # w_hh2
        jax.random.uniform(ks[6], (4 * I,), jnp.float32, -k2, k2),     # b_ih2
        jax.random.uniform(ks[7], (4 * I,), jnp.float32, -k2, k2),     # b_hh2
    )

    emb_inp = jax.random.normal(ks[8], (B, E), jnp.float32)

    out = lstm_decoder(emb_inp, params)
    out = jax.block_until_ready(out)

    ref = lstm_decoder_ref(emb_inp, params)
    assert out.shape == (B, STEP, I)
    assert jnp.allclose(out, ref, atol=2e-5, rtol=1e-5), "mismatch vs JAX reference"

    print("KERNEL_OK")
</pallas_src>

<mosaic_0001>
module attributes {stable_mosaic.version = 11 : i64} {
  func.func @lstm_decoder_kernel(%arg0: memref<8x32xf32, #tpu.memory_space<vmem>>, %arg1: memref<32x256xf32, #tpu.memory_space<vmem>>, %arg2: memref<64x320xf32, #tpu.memory_space<vmem>>, %arg3: memref<16x64xf32, #tpu.memory_space<vmem>>, %arg4: memref<1x256xf32, #tpu.memory_space<vmem>>, %arg5: memref<1x64xf32, #tpu.memory_space<vmem>>, %arg6: memref<8x128xf32, #tpu.memory_space<vmem>>) attributes {dimension_semantics = [], scalar_prefetch = 0 : i64, scratch_operands = 0 : i64, tpu.core_type = #tpu.core_type<tc>} {
    %c0 = arith.constant 0 : index
    %c0_0 = arith.constant 0 : index
    %0 = vector.load %arg0[%c0, %c0_0] : memref<8x32xf32, #tpu.memory_space<vmem>>, vector<8x32xf32>
    %c0_1 = arith.constant 0 : index
    %c0_2 = arith.constant 0 : index
    %1 = vector.load %arg1[%c0_1, %c0_2] : memref<32x256xf32, #tpu.memory_space<vmem>>, vector<32x256xf32>
    %cst = arith.constant dense<0.000000e+00> : vector<8x256xf32>
    %2 = tpu.matmul %0, %1, %cst {dimension_numbers = #tpu.dot_dimension_numbers<[1], [0], [0], [1], [0, 0, 1, 1], [], []>} : vector<8x32xf32>, vector<32x256xf32>, vector<8x256xf32> -> vector<8x256xf32>
    %c0_3 = arith.constant 0 : index
    %c0_4 = arith.constant 0 : index
    %3 = vector.load %arg4[%c0_3, %c0_4] : memref<1x256xf32, #tpu.memory_space<vmem>>, vector<1x256xf32>
    %4 = vector.broadcast %3 : vector<1x256xf32> to vector<8x256xf32>
    %5 = arith.addf %2, %4 : vector<8x256xf32>
    %c0_5 = arith.constant 0 : index
    %c0_6 = arith.constant 0 : index
    %6 = vector.load %arg2[%c0_5, %c0_6] : memref<64x320xf32, #tpu.memory_space<vmem>>, vector<64x320xf32>
    %c0_7 = arith.constant 0 : index
    %c0_8 = arith.constant 0 : index
    %7 = vector.load %arg3[%c0_7, %c0_8] : memref<16x64xf32, #tpu.memory_space<vmem>>, vector<16x64xf32>
    %c0_9 = arith.constant 0 : index
    %c0_10 = arith.constant 0 : index
    %8 = vector.load %arg5[%c0_9, %c0_10] : memref<1x64xf32, #tpu.memory_space<vmem>>, vector<1x64xf32>
    %9 = vector.shape_cast %8 : vector<1x64xf32> to vector<1x64xf32>
    %10 = vector.broadcast %9 : vector<1x64xf32> to vector<8x64xf32>
    %cst_11 = arith.constant 0.000000e+00 : f32
    %11 = vector.broadcast %cst_11 : f32 to vector<8x256xf32>
    %cst_12 = arith.constant 0.000000e+00 : f32
    %12 = vector.broadcast %cst_12 : f32 to vector<8x64xf32>
    %cst_13 = arith.constant 0.000000e+00 : f32
    %13 = vector.broadcast %cst_13 : f32 to vector<8x16xf32>
    %cst_14 = arith.constant 0.000000e+00 : f32
    %14 = vector.broadcast %cst_14 : f32 to vector<8x16xf32>
    %cst_15 = arith.constant dense<0.000000e+00> : vector<8x64xf32>
    %15 = tpu.matmul %13, %7, %cst_15 {dimension_numbers = #tpu.dot_dimension_numbers<[1], [0], [0], [1], [0, 0, 1, 1], [], []>} : vector<8x16xf32>, vector<16x64xf32>, vector<8x64xf32> -> vector<8x64xf32>
    %16 = arith.addf %5, %11 : vector<8x256xf32>
    %17 = arith.negf %16 : vector<8x256xf32>
    %18 = math.exp %17 : vector<8x256xf32>
    %cst_16 = arith.constant 1.000000e+00 : f32
    %19 = vector.broadcast %cst_16 : f32 to vector<8x256xf32>
    %20 = arith.addf %19, %18 : vector<8x256xf32>
    %21 = arith.divf %19, %20 : vector<8x256xf32>
    %22 = vector.extract_strided_slice %21 {offsets = [0, 0], sizes = [8, 64], strides = [1, 1]} : vector<8x256xf32> to vector<8x64xf32>
    %23 = vector.extract_strided_slice %21 {offsets = [0, 64], sizes = [8, 64], strides = [1, 1]} : vector<8x256xf32> to vector<8x64xf32>
    %24 = vector.extract_strided_slice %21 {offsets = [0, 128], sizes = [8, 64], strides = [1, 1]} : vector<8x256xf32> to vector<8x64xf32>
    %25 = vector.extract_strided_slice %16 {offsets = [0, 192], sizes = [8, 64], strides = [1, 1]} : vector<8x256xf32> to vector<8x64xf32>
    %26 = math.tanh %25 : vector<8x64xf32>
    %27 = arith.mulf %22, %12 : vector<8x64xf32>
    %28 = arith.mulf %23, %26 : vector<8x64xf32>
    %29 = arith.addf %27, %28 : vector<8x64xf32>
    %30 = math.tanh %29 : vector<8x64xf32>
    %31 = arith.mulf %24, %30 : vector<8x64xf32>
    %cst_17 = arith.constant dense<0.000000e+00> : vector<8x320xf32>
    %32 = tpu.matmul %31, %6, %cst_17 {dimension_numbers = #tpu.dot_dimension_numbers<[1], [0], [0], [1], [0, 0, 1, 1], [], []>} : vector<8x64xf32>, vector<64x320xf32>, vector<8x320xf32> -> vector<8x320xf32>
    %33 = vector.extract_strided_slice %32 {offsets = [0, 0], sizes = [8, 64], strides = [1, 1]} : vector<8x320xf32> to vector<8x64xf32>
    %34 = arith.addf %33, %15 : vector<8x64xf32>
    %35 = arith.addf %34, %10 : vector<8x64xf32>
    %36 = vector.extract_strided_slice %32 {offsets = [0, 64], sizes = [8, 256], strides = [1, 1]} : vector<8x320xf32> to vector<8x256xf32>
    %37 = arith.negf %35 : vector<8x64xf32>
    %38 = math.exp %37 : vector<8x64xf32>
    %cst_18 = arith.constant 1.000000e+00 : f32
    %39 = vector.broadcast %cst_18 : f32 to vector<8x64xf32>
    %40 = arith.addf %39, %38 : vector<8x64xf32>
    %41 = arith.divf %39, %40 : vector<8x64xf32>
    %42 = vector.extract_strided_slice %41 {offsets = [0, 0], sizes = [8, 16], strides = [1, 1]} : vector<8x64xf32> to vector<8x16xf32>
    %43 = vector.extract_strided_slice %41 {offsets = [0, 16], sizes = [8, 16], strides = [1, 1]} : vector<8x64xf32> to vector<8x16xf32>
    %44 = vector.extract_strided_slice %41 {offsets = [0, 32], sizes = [8, 16], strides = [1, 1]} : vector<8x64xf32> to vector<8x16xf32>
    %45 = vector.extract_strided_slice %35 {offsets = [0, 48], sizes = [8, 16], strides = [1, 1]} : vector<8x64xf32> to vector<8x16xf32>
    %46 = math.tanh %45 : vector<8x16xf32>
    %47 = arith.mulf %42, %14 : vector<8x16xf32>
    %48 = arith.mulf %43, %46 : vector<8x16xf32>
    %49 = arith.addf %47, %48 : vector<8x16xf32>
    %50 = math.tanh %49 : vector<8x16xf32>
    %51 = arith.mulf %44, %50 : vector<8x16xf32>
    %c0_19 = arith.constant 0 : index
    %c0_20 = arith.constant 0 : index
    %52 = vector.load %arg6[%c0_19, %c0_20] : memref<8x128xf32, #tpu.memory_space<vmem>>, vector<8x16xf32>
    tpu.vector_store %arg6[%c0_19, %c0_20], %51 {strides = array<i32>} : memref<8x128xf32, #tpu.memory_space<vmem>>, vector<8x16xf32>,
    %cst_21 = arith.constant dense<0.000000e+00> : vector<8x64xf32>
    %53 = tpu.matmul %51, %7, %cst_21 {dimension_numbers = #tpu.dot_dimension_numbers<[1], [0], [0], [1], [0, 0, 1, 1], [], []>} : vector<8x16xf32>, vector<16x64xf32>, vector<8x64xf32> -> vector<8x64xf32>
    %54 = arith.addf %5, %36 : vector<8x256xf32>
    %55 = arith.negf %54 : vector<8x256xf32>
    %56 = math.exp %55 : vector<8x256xf32>
    %cst_22 = arith.constant 1.000000e+00 : f32
    %57 = vector.broadcast %cst_22 : f32 to vector<8x256xf32>
    %58 = arith.addf %57, %56 : vector<8x256xf32>
    %59 = arith.divf %57, %58 : vector<8x256xf32>
    %60 = vector.extract_strided_slice %59 {offsets = [0, 0], sizes = [8, 64], strides = [1, 1]} : vector<8x256xf32> to vector<8x64xf32>
    %61 = vector.extract_strided_slice %59 {offsets = [0, 64], sizes = [8, 64], strides = [1, 1]} : vector<8x256xf32> to vector<8x64xf32>
    %62 = vector.extract_strided_slice %59 {offsets = [0, 128], sizes = [8, 64], strides = [1, 1]} : vector<8x256xf32> to vector<8x64xf32>
    %63 = vector.extract_strided_slice %54 {offsets = [0, 192], sizes = [8, 64], strides = [1, 1]} : vector<8x256xf32> to vector<8x64xf32>
    %64 = math.tanh %63 : vector<8x64xf32>
    %65 = arith.mulf %60, %29 : vector<8x64xf32>
    %66 = arith.mulf %61, %64 : vector<8x64xf32>
    %67 = arith.addf %65, %66 : vector<8x64xf32>
    %68 = math.tanh %67 : vector<8x64xf32>
    %69 = arith.mulf %62, %68 : vector<8x64xf32>
    %cst_23 = arith.constant dense<0.000000e+00> : vector<8x320xf32>
    %70 = tpu.matmul %69, %6, %cst_23 {dimension_numbers = #tpu.dot_dimension_numbers<[1], [0], [0], [1], [0, 0, 1, 1], [], []>} : vector<8x64xf32>, vector<64x320xf32>, vector<8x320xf32> -> vector<8x320xf32>
    %71 = vector.extract_strided_slice %70 {offsets = [0, 0], sizes = [8, 64], strides = [1, 1]} : vector<8x320xf32> to vector<8x64xf32>
    %72 = arith.addf %71, %53 : vector<8x64xf32>
    %73 = arith.addf %72, %10 : vector<8x64xf32>
    %74 = vector.extract_strided_slice %70 {offsets = [0, 64], sizes = [8, 256], strides = [1, 1]} : vector<8x320xf32> to vector<8x256xf32>
    %75 = arith.negf %73 : vector<8x64xf32>
    %76 = math.exp %75 : vector<8x64xf32>
    %cst_24 = arith.constant 1.000000e+00 : f32
    %77 = vector.broadcast %cst_24 : f32 to vector<8x64xf32>
    %78 = arith.addf %77, %76 : vector<8x64xf32>
    %79 = arith.divf %77, %78 : vector<8x64xf32>
    %80 = vector.extract_strided_slice %79 {offsets = [0, 0], sizes = [8, 16], strides = [1, 1]} : vector<8x64xf32> to vector<8x16xf32>
    %81 = vector.extract_strided_slice %79 {offsets = [0, 16], sizes = [8, 16], strides = [1, 1]} : vector<8x64xf32> to vector<8x16xf32>
    %82 = vector.extract_strided_slice %79 {offsets = [0, 32], sizes = [8, 16], strides = [1, 1]} : vector<8x64xf32> to vector<8x16xf32>
    %83 = vector.extract_strided_slice %73 {offsets = [0, 48], sizes = [8, 16], strides = [1, 1]} : vector<8x64xf32> to vector<8x16xf32>
    %84 = math.tanh %83 : vector<8x16xf32>
    %85 = arith.mulf %80, %49 : vector<8x16xf32>
    %86 = arith.mulf %81, %84 : vector<8x16xf32>
    %87 = arith.addf %85, %86 : vector<8x16xf32>
    %88 = math.tanh %87 : vector<8x16xf32>
    %89 = arith.mulf %82, %88 : vector<8x16xf32>
    %c0_25 = arith.constant 0 : index
    %c16 = arith.constant 16 : index
    %90 = vector.load %arg6[%c0_25, %c16] : memref<8x128xf32, #tpu.memory_space<vmem>>, vector<8x16xf32>
    tpu.vector_store %arg6[%c0_25, %c16], %89 {strides = array<i32>} : memref<8x128xf32, #tpu.memory_space<vmem>>, vector<8x16xf32>,
    %cst_26 = arith.constant dense<0.000000e+00> : vector<8x64xf32>
    %91 = tpu.matmul %89, %7, %cst_26 {dimension_numbers = #tpu.dot_dimension_numbers<[1], [0], [0], [1], [0, 0, 1, 1], [], []>} : vector<8x16xf32>, vector<16x64xf32>, vector<8x64xf32> -> vector<8x64xf32>
    %92 = arith.addf %5, %74 : vector<8x256xf32>
    %93 = arith.negf %92 : vector<8x256xf32>
    %94 = math.exp %93 : vector<8x256xf32>
    %cst_27 = arith.constant 1.000000e+00 : f32
    %95 = vector.broadcast %cst_27 : f32 to vector<8x256xf32>
    %96 = arith.addf %95, %94 : vector<8x256xf32>
    %97 = arith.divf %95, %96 : vector<8x256xf32>
    %98 = vector.extract_strided_slice %97 {offsets = [0, 0], sizes = [8, 64], strides = [1, 1]} : vector<8x256xf32> to vector<8x64xf32>
    %99 = vector.extract_strided_slice %97 {offsets = [0, 64], sizes = [8, 64], strides = [1, 1]} : vector<8x256xf32> to vector<8x64xf32>
    %100 = vector.extract_strided_slice %97 {offsets = [0, 128], sizes = [8, 64], strides = [1, 1]} : vector<8x256xf32> to vector<8x64xf32>
    %101 = vector.extract_strided_slice %92 {offsets = [0, 192], sizes = [8, 64], strides = [1, 1]} : vector<8x256xf32> to vector<8x64xf32>
    %102 = math.tanh %101 : vector<8x64xf32>
    %103 = arith.mulf %98, %67 : vector<8x64xf32>
    %104 = arith.mulf %99, %102 : vector<8x64xf32>
    %105 = arith.addf %103, %104 : vector<8x64xf32>
    %106 = math.tanh %105 : vector<8x64xf32>
    %107 = arith.mulf %100, %106 : vector<8x64xf32>
    %cst_28 = arith.constant dense<0.000000e+00> : vector<8x320xf32>
    %108 = tpu.matmul %107, %6, %cst_28 {dimension_numbers = #tpu.dot_dimension_numbers<[1], [0], [0], [1], [0, 0, 1, 1], [], []>} : vector<8x64xf32>, vector<64x320xf32>, vector<8x320xf32> -> vector<8x320xf32>
    %109 = vector.extract_strided_slice %108 {offsets = [0, 0], sizes = [8, 64], strides = [1, 1]} : vector<8x320xf32> to vector<8x64xf32>
    %110 = arith.addf %109, %91 : vector<8x64xf32>
    %111 = arith.addf %110, %10 : vector<8x64xf32>
    %112 = vector.extract_strided_slice %108 {offsets = [0, 64], sizes = [8, 256], strides = [1, 1]} : vector<8x320xf32> to vector<8x256xf32>
    %113 = arith.negf %111 : vector<8x64xf32>
    %114 = math.exp %113 : vector<8x64xf32>
    %cst_29 = arith.constant 1.000000e+00 : f32
    %115 = vector.broadcast %cst_29 : f32 to vector<8x64xf32>
    %116 = arith.addf %115, %114 : vector<8x64xf32>
    %117 = arith.divf %115, %116 : vector<8x64xf32>
    %118 = vector.extract_strided_slice %117 {offsets = [0, 0], sizes = [8, 16], strides = [1, 1]} : vector<8x64xf32> to vector<8x16xf32>
    %119 = vector.extract_strided_slice %117 {offsets = [0, 16], sizes = [8, 16], strides = [1, 1]} : vector<8x64xf32> to vector<8x16xf32>
    %120 = vector.extract_strided_slice %117 {offsets = [0, 32], sizes = [8, 16], strides = [1, 1]} : vector<8x64xf32> to vector<8x16xf32>
    %121 = vector.extract_strided_slice %111 {offsets = [0, 48], sizes = [8, 16], strides = [1, 1]} : vector<8x64xf32> to vector<8x16xf32>
    %122 = math.tanh %121 : vector<8x16xf32>
    %123 = arith.mulf %118, %87 : vector<8x16xf32>
    %124 = arith.mulf %119, %122 : vector<8x16xf32>
    %125 = arith.addf %123, %124 : vector<8x16xf32>
    %126 = math.tanh %125 : vector<8x16xf32>
    %127 = arith.mulf %120, %126 : vector<8x16xf32>
    %c0_30 = arith.constant 0 : index
    %c32 = arith.constant 32 : index
    %128 = vector.load %arg6[%c0_30, %c32] : memref<8x128xf32, #tpu.memory_space<vmem>>, vector<8x16xf32>
    tpu.vector_store %arg6[%c0_30, %c32], %127 {strides = array<i32>} : memref<8x128xf32, #tpu.memory_space<vmem>>, vector<8x16xf32>,
    %cst_31 = arith.constant dense<0.000000e+00> : vector<8x64xf32>
    %129 = tpu.matmul %127, %7, %cst_31 {dimension_numbers = #tpu.dot_dimension_numbers<[1], [0], [0], [1], [0, 0, 1, 1], [], []>} : vector<8x16xf32>, vector<16x64xf32>, vector<8x64xf32> -> vector<8x64xf32>
    %130 = arith.addf %5, %112 : vector<8x256xf32>
    %131 = arith.negf %130 : vector<8x256xf32>
    %132 = math.exp %131 : vector<8x256xf32>
    %cst_32 = arith.constant 1.000000e+00 : f32
    %133 = vector.broadcast %cst_32 : f32 to vector<8x256xf32>
    %134 = arith.addf %133, %132 : vector<8x256xf32>
    %135 = arith.divf %133, %134 : vector<8x256xf32>
    %136 = vector.extract_strided_slice %135 {offsets = [0, 0], sizes = [8, 64], strides = [1, 1]} : vector<8x256xf32> to vector<8x64xf32>
    %137 = vector.extract_strided_slice %135 {offsets = [0, 64], sizes = [8, 64], strides = [1, 1]} : vector<8x256xf32> to vector<8x64xf32>
    %138 = vector.extract_strided_slice %135 {offsets = [0, 128], sizes = [8, 64], strides = [1, 1]} : vector<8x256xf32> to vector<8x64xf32>
    %139 = vector.extract_strided_slice %130 {offsets = [0, 192], sizes = [8, 64], strides = [1, 1]} : vector<8x256xf32> to vector<8x64xf32>
    %140 = math.tanh %139 : vector<8x64xf32>
    %141 = arith.mulf %136, %105 : vector<8x64xf32>
    %142 = arith.mulf %137, %140 : vector<8x64xf32>
    %143 = arith.addf %141, %142 : vector<8x64xf32>
    %144 = math.tanh %143 : vector<8x64xf32>
    %145 = arith.mulf %138, %144 : vector<8x64xf32>
    %cst_33 = arith.constant dense<0.000000e+00> : vector<8x320xf32>
    %146 = tpu.matmul %145, %6, %cst_33 {dimension_numbers = #tpu.dot_dimension_numbers<[1], [0], [0], [1], [0, 0, 1, 1], [], []>} : vector<8x64xf32>, vector<64x320xf32>, vector<8x320xf32> -> vector<8x320xf32>
    %147 = vector.extract_strided_slice %146 {offsets = [0, 0], sizes = [8, 64], strides = [1, 1]} : vector<8x320xf32> to vector<8x64xf32>
    %148 = arith.addf %147, %129 : vector<8x64xf32>
    %149 = arith.addf %148, %10 : vector<8x64xf32>
    %150 = vector.extract_strided_slice %146 {offsets = [0, 64], sizes = [8, 256], strides = [1, 1]} : vector<8x320xf32> to vector<8x256xf32>
    %151 = arith.negf %149 : vector<8x64xf32>
    %152 = math.exp %151 : vector<8x64xf32>
    %cst_34 = arith.constant 1.000000e+00 : f32
    %153 = vector.broadcast %cst_34 : f32 to vector<8x64xf32>
    %154 = arith.addf %153, %152 : vector<8x64xf32>
    %155 = arith.divf %153, %154 : vector<8x64xf32>
    %156 = vector.extract_strided_slice %155 {offsets = [0, 0], sizes = [8, 16], strides = [1, 1]} : vector<8x64xf32> to vector<8x16xf32>
    %157 = vector.extract_strided_slice %155 {offsets = [0, 16], sizes = [8, 16], strides = [1, 1]} : vector<8x64xf32> to vector<8x16xf32>
    %158 = vector.extract_strided_slice %155 {offsets = [0, 32], sizes = [8, 16], strides = [1, 1]} : vector<8x64xf32> to vector<8x16xf32>
    %159 = vector.extract_strided_slice %149 {offsets = [0, 48], sizes = [8, 16], strides = [1, 1]} : vector<8x64xf32> to vector<8x16xf32>
    %160 = math.tanh %159 : vector<8x16xf32>
    %161 = arith.mulf %156, %125 : vector<8x16xf32>
    %162 = arith.mulf %157, %160 : vector<8x16xf32>
    %163 = arith.addf %161, %162 : vector<8x16xf32>
    %164 = math.tanh %163 : vector<8x16xf32>
    %165 = arith.mulf %158, %164 : vector<8x16xf32>
    %c0_35 = arith.constant 0 : index
    %c48 = arith.constant 48 : index
    %166 = vector.load %arg6[%c0_35, %c48] : memref<8x128xf32, #tpu.memory_space<vmem>>, vector<8x16xf32>
    tpu.vector_store %arg6[%c0_35, %c48], %165 {strides = array<i32>} : memref<8x128xf32, #tpu.memory_space<vmem>>, vector<8x16xf32>,
    %cst_36 = arith.constant dense<0.000000e+00> : vector<8x64xf32>
    %167 = tpu.matmul %165, %7, %cst_36 {dimension_numbers = #tpu.dot_dimension_numbers<[1], [0], [0], [1], [0, 0, 1, 1], [], []>} : vector<8x16xf32>, vector<16x64xf32>, vector<8x64xf32> -> vector<8x64xf32>
    %168 = arith.addf %5, %150 : vector<8x256xf32>
    %169 = arith.negf %168 : vector<8x256xf32>
    %170 = math.exp %169 : vector<8x256xf32>
    %cst_37 = arith.constant 1.000000e+00 : f32
    %171 = vector.broadcast %cst_37 : f32 to vector<8x256xf32>
    %172 = arith.addf %171, %170 : vector<8x256xf32>
    %173 = arith.divf %171, %172 : vector<8x256xf32>
    %174 = vector.extract_strided_slice %173 {offsets = [0, 0], sizes = [8, 64], strides = [1, 1]} : vector<8x256xf32> to vector<8x64xf32>
    %175 = vector.extract_strided_slice %173 {offsets = [0, 64], sizes = [8, 64], strides = [1, 1]} : vector<8x256xf32> to vector<8x64xf32>
    %176 = vector.extract_strided_slice %173 {offsets = [0, 128], sizes = [8, 64], strides = [1, 1]} : vector<8x256xf32> to vector<8x64xf32>
    %177 = vector.extract_strided_slice %168 {offsets = [0, 192], sizes = [8, 64], strides = [1, 1]} : vector<8x256xf32> to vector<8x64xf32>
    %178 = math.tanh %177 : vector<8x64xf32>
    %179 = arith.mulf %174, %143 : vector<8x64xf32>
    %180 = arith.mulf %175, %178 : vector<8x64xf32>
    %181 = arith.addf %179, %180 : vector<8x64xf32>
    %182 = math.tanh %181 : vector<8x64xf32>
    %183 = arith.mulf %176, %182 : vector<8x64xf32>
    %cst_38 = arith.constant dense<0.000000e+00> : vector<8x320xf32>
    %184 = tpu.matmul %183, %6, %cst_38 {dimension_numbers = #tpu.dot_dimension_numbers<[1], [0], [0], [1], [0, 0, 1, 1], [], []>} : vector<8x64xf32>, vector<64x320xf32>, vector<8x320xf32> -> vector<8x320xf32>
    %185 = vector.extract_strided_slice %184 {offsets = [0, 0], sizes = [8, 64], strides = [1, 1]} : vector<8x320xf32> to vector<8x64xf32>
    %186 = arith.addf %185, %167 : vector<8x64xf32>
    %187 = arith.addf %186, %10 : vector<8x64xf32>
    %188 = vector.extract_strided_slice %184 {offsets = [0, 64], sizes = [8, 256], strides = [1, 1]} : vector<8x320xf32> to vector<8x256xf32>
    %189 = arith.negf %187 : vector<8x64xf32>
    %190 = math.exp %189 : vector<8x64xf32>
    %cst_39 = arith.constant 1.000000e+00 : f32
    %191 = vector.broadcast %cst_39 : f32 to vector<8x64xf32>
    %192 = arith.addf %191, %190 : vector<8x64xf32>
    %193 = arith.divf %191, %192 : vector<8x64xf32>
    %194 = vector.extract_strided_slice %193 {offsets = [0, 0], sizes = [8, 16], strides = [1, 1]} : vector<8x64xf32> to vector<8x16xf32>
    %195 = vector.extract_strided_slice %193 {offsets = [0, 16], sizes = [8, 16], strides = [1, 1]} : vector<8x64xf32> to vector<8x16xf32>
    %196 = vector.extract_strided_slice %193 {offsets = [0, 32], sizes = [8, 16], strides = [1, 1]} : vector<8x64xf32> to vector<8x16xf32>
    %197 = vector.extract_strided_slice %187 {offsets = [0, 48], sizes = [8, 16], strides = [1, 1]} : vector<8x64xf32> to vector<8x16xf32>
    %198 = math.tanh %197 : vector<8x16xf32>
    %199 = arith.mulf %194, %163 : vector<8x16xf32>
    %200 = arith.mulf %195, %198 : vector<8x16xf32>
    %201 = arith.addf %199, %200 : vector<8x16xf32>
    %202 = math.tanh %201 : vector<8x16xf32>
    %203 = arith.mulf %196, %202 : vector<8x16xf32>
    %c0_40 = arith.constant 0 : index
    %c64 = arith.constant 64 : index
    %204 = vector.load %arg6[%c0_40, %c64] : memref<8x128xf32, #tpu.memory_space<vmem>>, vector<8x16xf32>
    tpu.vector_store %arg6[%c0_40, %c64], %203 {strides = array<i32>} : memref<8x128xf32, #tpu.memory_space<vmem>>, vector<8x16xf32>,
    %cst_41 = arith.constant dense<0.000000e+00> : vector<8x64xf32>
    %205 = tpu.matmul %203, %7, %cst_41 {dimension_numbers = #tpu.dot_dimension_numbers<[1], [0], [0], [1], [0, 0, 1, 1], [], []>} : vector<8x16xf32>, vector<16x64xf32>, vector<8x64xf32> -> vector<8x64xf32>
    %206 = arith.addf %5, %188 : vector<8x256xf32>
    %207 = arith.negf %206 : vector<8x256xf32>
    %208 = math.exp %207 : vector<8x256xf32>
    %cst_42 = arith.constant 1.000000e+00 : f32
    %209 = vector.broadcast %cst_42 : f32 to vector<8x256xf32>
    %210 = arith.addf %209, %208 : vector<8x256xf32>
    %211 = arith.divf %209, %210 : vector<8x256xf32>
    %212 = vector.extract_strided_slice %211 {offsets = [0, 0], sizes = [8, 64], strides = [1, 1]} : vector<8x256xf32> to vector<8x64xf32>
    %213 = vector.extract_strided_slice %211 {offsets = [0, 64], sizes = [8, 64], strides = [1, 1]} : vector<8x256xf32> to vector<8x64xf32>
    %214 = vector.extract_strided_slice %211 {offsets = [0, 128], sizes = [8, 64], strides = [1, 1]} : vector<8x256xf32> to vector<8x64xf32>
    %215 = vector.extract_strided_slice %206 {offsets = [0, 192], sizes = [8, 64], strides = [1, 1]} : vector<8x256xf32> to vector<8x64xf32>
    %216 = math.tanh %215 : vector<8x64xf32>
    %217 = arith.mulf %212, %181 : vector<8x64xf32>
    %218 = arith.mulf %213, %216 : vector<8x64xf32>
    %219 = arith.addf %217, %218 : vector<8x64xf32>
    %220 = math.tanh %219 : vector<8x64xf32>
    %221 = arith.mulf %214, %220 : vector<8x64xf32>
    %cst_43 = arith.constant dense<0.000000e+00> : vector<8x320xf32>
    %222 = tpu.matmul %221, %6, %cst_43 {dimension_numbers = #tpu.dot_dimension_numbers<[1], [0], [0], [1], [0, 0, 1, 1], [], []>} : vector<8x64xf32>, vector<64x320xf32>, vector<8x320xf32> -> vector<8x320xf32>
    %223 = vector.extract_strided_slice %222 {offsets = [0, 0], sizes = [8, 64], strides = [1, 1]} : vector<8x320xf32> to vector<8x64xf32>
    %224 = arith.addf %223, %205 : vector<8x64xf32>
    %225 = arith.addf %224, %10 : vector<8x64xf32>
    %226 = vector.extract_strided_slice %222 {offsets = [0, 64], sizes = [8, 256], strides = [1, 1]} : vector<8x320xf32> to vector<8x256xf32>
    %227 = arith.negf %225 : vector<8x64xf32>
    %228 = math.exp %227 : vector<8x64xf32>
    %cst_44 = arith.constant 1.000000e+00 : f32
    %229 = vector.broadcast %cst_44 : f32 to vector<8x64xf32>
    %230 = arith.addf %229, %228 : vector<8x64xf32>
    %231 = arith.divf %229, %230 : vector<8x64xf32>
    %232 = vector.extract_strided_slice %231 {offsets = [0, 0], sizes = [8, 16], strides = [1, 1]} : vector<8x64xf32> to vector<8x16xf32>
    %233 = vector.extract_strided_slice %231 {offsets = [0, 16], sizes = [8, 16], strides = [1, 1]} : vector<8x64xf32> to vector<8x16xf32>
    %234 = vector.extract_strided_slice %231 {offsets = [0, 32], sizes = [8, 16], strides = [1, 1]} : vector<8x64xf32> to vector<8x16xf32>
    %235 = vector.extract_strided_slice %225 {offsets = [0, 48], sizes = [8, 16], strides = [1, 1]} : vector<8x64xf32> to vector<8x16xf32>
    %236 = math.tanh %235 : vector<8x16xf32>
    %237 = arith.mulf %232, %201 : vector<8x16xf32>
    %238 = arith.mulf %233, %236 : vector<8x16xf32>
    %239 = arith.addf %237, %238 : vector<8x16xf32>
    %240 = math.tanh %239 : vector<8x16xf32>
    %241 = arith.mulf %234, %240 : vector<8x16xf32>
    %c0_45 = arith.constant 0 : index
    %c80 = arith.constant 80 : index
    %242 = vector.load %arg6[%c0_45, %c80] : memref<8x128xf32, #tpu.memory_space<vmem>>, vector<8x16xf32>
    tpu.vector_store %arg6[%c0_45, %c80], %241 {strides = array<i32>} : memref<8x128xf32, #tpu.memory_space<vmem>>, vector<8x16xf32>,
    %cst_46 = arith.constant dense<0.000000e+00> : vector<8x64xf32>
    %243 = tpu.matmul %241, %7, %cst_46 {dimension_numbers = #tpu.dot_dimension_numbers<[1], [0], [0], [1], [0, 0, 1, 1], [], []>} : vector<8x16xf32>, vector<16x64xf32>, vector<8x64xf32> -> vector<8x64xf32>
    %244 = arith.addf %5, %226 : vector<8x256xf32>
    %245 = arith.negf %244 : vector<8x256xf32>
    %246 = math.exp %245 : vector<8x256xf32>
    %cst_47 = arith.constant 1.000000e+00 : f32
    %247 = vector.broadcast %cst_47 : f32 to vector<8x256xf32>
    %248 = arith.addf %247, %246 : vector<8x256xf32>
    %249 = arith.divf %247, %248 : vector<8x256xf32>
    %250 = vector.extract_strided_slice %249 {offsets = [0, 0], sizes = [8, 64], strides = [1, 1]} : vector<8x256xf32> to vector<8x64xf32>
    %251 = vector.extract_strided_slice %249 {offsets = [0, 64], sizes = [8, 64], strides = [1, 1]} : vector<8x256xf32> to vector<8x64xf32>
    %252 = vector.extract_strided_slice %249 {offsets = [0, 128], sizes = [8, 64], strides = [1, 1]} : vector<8x256xf32> to vector<8x64xf32>
    %253 = vector.extract_strided_slice %244 {offsets = [0, 192], sizes = [8, 64], strides = [1, 1]} : vector<8x256xf32> to vector<8x64xf32>
    %254 = math.tanh %253 : vector<8x64xf32>
    %255 = arith.mulf %250, %219 : vector<8x64xf32>
    %256 = arith.mulf %251, %254 : vector<8x64xf32>
    %257 = arith.addf %255, %256 : vector<8x64xf32>
    %258 = math.tanh %257 : vector<8x64xf32>
    %259 = arith.mulf %252, %258 : vector<8x64xf32>
    %cst_48 = arith.constant dense<0.000000e+00> : vector<8x320xf32>
    %260 = tpu.matmul %259, %6, %cst_48 {dimension_numbers = #tpu.dot_dimension_numbers<[1], [0], [0], [1], [0, 0, 1, 1], [], []>} : vector<8x64xf32>, vector<64x320xf32>, vector<8x320xf32> -> vector<8x320xf32>
    %261 = vector.extract_strided_slice %260 {offsets = [0, 0], sizes = [8, 64], strides = [1, 1]} : vector<8x320xf32> to vector<8x64xf32>
    %262 = arith.addf %261, %243 : vector<8x64xf32>
    %263 = arith.addf %262, %10 : vector<8x64xf32>
    %264 = vector.extract_strided_slice %260 {offsets = [0, 64], sizes = [8, 256], strides = [1, 1]} : vector<8x320xf32> to vector<8x256xf32>
    %265 = arith.negf %263 : vector<8x64xf32>
    %266 = math.exp %265 : vector<8x64xf32>
    %cst_49 = arith.constant 1.000000e+00 : f32
    %267 = vector.broadcast %cst_49 : f32 to vector<8x64xf32>
    %268 = arith.addf %267, %266 : vector<8x64xf32>
    %269 = arith.divf %267, %268 : vector<8x64xf32>
    %270 = vector.extract_strided_slice %269 {offsets = [0, 0], sizes = [8, 16], strides = [1, 1]} : vector<8x64xf32> to vector<8x16xf32>
    %271 = vector.extract_strided_slice %269 {offsets = [0, 16], sizes = [8, 16], strides = [1, 1]} : vector<8x64xf32> to vector<8x16xf32>
    %272 = vector.extract_strided_slice %269 {offsets = [0, 32], sizes = [8, 16], strides = [1, 1]} : vector<8x64xf32> to vector<8x16xf32>
    %273 = vector.extract_strided_slice %263 {offsets = [0, 48], sizes = [8, 16], strides = [1, 1]} : vector<8x64xf32> to vector<8x16xf32>
    %274 = math.tanh %273 : vector<8x16xf32>
    %275 = arith.mulf %270, %239 : vector<8x16xf32>
    %276 = arith.mulf %271, %274 : vector<8x16xf32>
    %277 = arith.addf %275, %276 : vector<8x16xf32>
    %278 = math.tanh %277 : vector<8x16xf32>
    %279 = arith.mulf %272, %278 : vector<8x16xf32>
    %c0_50 = arith.constant 0 : index
    %c96 = arith.constant 96 : index
    %280 = vector.load %arg6[%c0_50, %c96] : memref<8x128xf32, #tpu.memory_space<vmem>>, vector<8x16xf32>
    tpu.vector_store %arg6[%c0_50, %c96], %279 {strides = array<i32>} : memref<8x128xf32, #tpu.memory_space<vmem>>, vector<8x16xf32>,
    %cst_51 = arith.constant dense<0.000000e+00> : vector<8x64xf32>
    %281 = tpu.matmul %279, %7, %cst_51 {dimension_numbers = #tpu.dot_dimension_numbers<[1], [0], [0], [1], [0, 0, 1, 1], [], []>} : vector<8x16xf32>, vector<16x64xf32>, vector<8x64xf32> -> vector<8x64xf32>
    %282 = arith.addf %5, %264 : vector<8x256xf32>
    %283 = arith.negf %282 : vector<8x256xf32>
    %284 = math.exp %283 : vector<8x256xf32>
    %cst_52 = arith.constant 1.000000e+00 : f32
    %285 = vector.broadcast %cst_52 : f32 to vector<8x256xf32>
    %286 = arith.addf %285, %284 : vector<8x256xf32>
    %287 = arith.divf %285, %286 : vector<8x256xf32>
    %288 = vector.extract_strided_slice %287 {offsets = [0, 0], sizes = [8, 64], strides = [1, 1]} : vector<8x256xf32> to vector<8x64xf32>
    %289 = vector.extract_strided_slice %287 {offsets = [0, 64], sizes = [8, 64], strides = [1, 1]} : vector<8x256xf32> to vector<8x64xf32>
    %290 = vector.extract_strided_slice %287 {offsets = [0, 128], sizes = [8, 64], strides = [1, 1]} : vector<8x256xf32> to vector<8x64xf32>
    %291 = vector.extract_strided_slice %282 {offsets = [0, 192], sizes = [8, 64], strides = [1, 1]} : vector<8x256xf32> to vector<8x64xf32>
    %292 = math.tanh %291 : vector<8x64xf32>
    %293 = arith.mulf %288, %257 : vector<8x64xf32>
    %294 = arith.mulf %289, %292 : vector<8x64xf32>
    %295 = arith.addf %293, %294 : vector<8x64xf32>
    %296 = math.tanh %295 : vector<8x64xf32>
    %297 = arith.mulf %290, %296 : vector<8x64xf32>
    %cst_53 = arith.constant dense<0.000000e+00> : vector<8x320xf32>
    %298 = tpu.matmul %297, %6, %cst_53 {dimension_numbers = #tpu.dot_dimension_numbers<[1], [0], [0], [1], [0, 0, 1, 1], [], []>} : vector<8x64xf32>, vector<64x320xf32>, vector<8x320xf32> -> vector<8x320xf32>
    %299 = vector.extract_strided_slice %298 {offsets = [0, 0], sizes = [8, 64], strides = [1, 1]} : vector<8x320xf32> to vector<8x64xf32>
    %300 = arith.addf %299, %281 : vector<8x64xf32>
    %301 = arith.addf %300, %10 : vector<8x64xf32>
    %302 = arith.negf %301 : vector<8x64xf32>
    %303 = math.exp %302 : vector<8x64xf32>
    %cst_54 = arith.constant 1.000000e+00 : f32
    %304 = vector.broadcast %cst_54 : f32 to vector<8x64xf32>
    %305 = arith.addf %304, %303 : vector<8x64xf32>
    %306 = arith.divf %304, %305 : vector<8x64xf32>
    %307 = vector.extract_strided_slice %306 {offsets = [0, 0], sizes = [8, 16], strides = [1, 1]} : vector<8x64xf32> to vector<8x16xf32>
    %308 = vector.extract_strided_slice %306 {offsets = [0, 16], sizes = [8, 16], strides = [1, 1]} : vector<8x64xf32> to vector<8x16xf32>
    %309 = vector.extract_strided_slice %306 {offsets = [0, 32], sizes = [8, 16], strides = [1, 1]} : vector<8x64xf32> to vector<8x16xf32>
    %310 = vector.extract_strided_slice %301 {offsets = [0, 48], sizes = [8, 16], strides = [1, 1]} : vector<8x64xf32> to vector<8x16xf32>
    %311 = math.tanh %310 : vector<8x16xf32>
    %312 = arith.mulf %307, %277 : vector<8x16xf32>
    %313 = arith.mulf %308, %311 : vector<8x16xf32>
    %314 = arith.addf %312, %313 : vector<8x16xf32>
    %315 = math.tanh %314 : vector<8x16xf32>
    %316 = arith.mulf %309, %315 : vector<8x16xf32>
    %c0_55 = arith.constant 0 : index
    %c112 = arith.constant 112 : index
    %317 = vector.load %arg6[%c0_55, %c112] : memref<8x128xf32, #tpu.memory_space<vmem>>, vector<8x16xf32>
    tpu.vector_store %arg6[%c0_55, %c112], %316 {strides = array<i32>} : memref<8x128xf32, #tpu.memory_space<vmem>>, vector<8x16xf32>,
    return
  }
}

</mosaic_0001>

<bundles_post_ra>
// kernel: tpu_custom_call.1
= control target key start
LH: loop header
LB: loop body
LE: loop exit
PB: predicated region body
PF: predicated region fallthrough
CT: control target
= control target key end

     0   :  { %11 = vsyncpa [#allocation3], 0  ;;  %s2675_s0 = inlined_call_operand.hbm [shape: f32[8,32], index: 0, kind: input, shape index: {}]   ;;  %s2676_s1 = inlined_call_operand.hbm [shape: f32[32,256], index: 1, kind: input, shape index: {}]   ;;  %s2677_s2 = inlined_call_operand.hbm [shape: f32[64,320], index: 2, kind: input, shape index: {}]   ;;  %s2678_s3 = inlined_call_operand.hbm [shape: f32[16,64], index: 3, kind: input, shape index: {}]   ;;  %s2679_s4 = inlined_call_operand.vmem [shape: f32[1,256], index: 4, kind: input, shape index: {}]   ;;  %s2680_s5 = inlined_call_operand.vmem [shape: f32[1,64], index: 5, kind: input, shape index: {}]   ;;  %s2681_s6 = inlined_call_operand.hbm [shape: f32[8,128], index: 6, kind: output, shape index: {}]  }
   0x1   :  { %12 = vsyncpa [#allocation6], 0 }
   0x2   :  { %13 = vsyncpa [#allocation9], 0  ;;  %s30_s23 = sshll.u32 %s2676_s1, 4  ;;  %s31_s23 = int_to_ptr.hbm [resolvable:$true] %s30_s23 }
   0x3   :  { %14 = vsyncpa [#allocation4], 0  ;;  %s2084_s24 = smov [#allocation5]   ;;  %s20_s28 = sshll.u32 %s2675_s0, 4  ;;  %s21_s28 = int_to_ptr.hbm [resolvable:$true] %s20_s28 }
   0x4   :  { %s32_s25 = sshll.u32 %s2084_s24, 4  ;;  %s2085_s29 = smov 256   ;;  %s33_s25 = int_to_ptr.vmem [resolvable:$true] %s32_s25 }
   0x5   :  { %s2086_s30 = smov 16   ;;  %s2087_s7 = smov [#allocation2]  }
   0x6   :  { %38 = dma.hbm_to_vmem [thread:$0]  %s31_s23, 1024, %s33_s25, [#allocation6], %s2085_s29, %s2085_s29, %s2086_s30  }
   0x7   :  { %s22_s8 = sshll.u32 %s2087_s7, 4  ;;  %s43_s1 = sshll.u32 %s2677_s2, 4  ;;  %s23_s8 = int_to_ptr.vmem [resolvable:$true] %s22_s8  ;;  %s44_s1 = int_to_ptr.hbm [resolvable:$true] %s43_s1 }
   0x8   :  { %25 = dma.hbm_to_vmem [thread:$0]  %s21_s28, 128, %s23_s8, [#allocation3]  }
   0x9   :  { %s2088_s11 = smov [#allocation7]   ;;  %s56_s0 = sshll.u32 %s2678_s3, 4  ;;  %s57_s0 = int_to_ptr.hbm [resolvable:$true] %s56_s0 }
   0xa   :  { %s45_s12 = sshll.u32 %s2088_s11, 4  ;;  %s2089_s15 = smov 384   ;;  %s46_s12 = int_to_ptr.vmem [resolvable:$true] %s45_s12 }
   0xb   :  { %s2090_s16 = smov 24   ;;  %s2091_s17 = smov [#allocation8]  }
   0xc   :  { %51 = dma.hbm_to_vmem [thread:$0]  %s44_s1, 3072, %s46_s12, [#allocation6], %s2089_s15, %s2089_s15, %s2090_s16  }
   0xd   :  { %s58_s18 = sshll.u32 %s2091_s17, 4  ;;  %s2092_s19 = smov 128   ;;  %s59_s18 = int_to_ptr.vmem [resolvable:$true] %s58_s18 }
   0xe   :  { %s2093_s20 = smov 8  }
   0xf   :  { %64 = dma.hbm_to_vmem [thread:$0]  %s57_s0, 256, %s59_s18, [#allocation9], %s2092_s19, %s2092_s19, %s2093_s20  }
  0x10   :  { %2076 = dma.done.wait [#allocation3], 128  }
  0x11   :  { %2077 = vsyncadd [#allocation3], 4294967168 }
  0x12   :  { %2078 = dma.done.wait [#allocation6], 4096  }
  0x13   :  { %2079 = vsyncadd [#allocation6], 4294963200 }
  0x14   :  { %2080 = dma.done.wait [#allocation9], 256  }
  0x15   :  { %2081 = vsyncadd [#allocation9], 4294967040  ;;  %v92_v0 = vld [vmem:[#allocation5 + $0x30] sm:$0xff]  ;;  %v90_v1 = vld [vmem:[#allocation5 + $0x20] sm:$0xff]  ;;  %vm100_vm0 = vcmask 261120   ;;  %v2095_v50 = vmov 0.0  }
  0x16   :  { %116 = vmatpush.msra.mxu0 %v92_v0  ;;  %v93_v2 = vld [vmem:[#allocation5 + $0x38] sm:$0xff]  ;;  %v88_v3 = vld [vmem:[#allocation5 + $0x10] sm:$0xff]  ;;  %v91_v4 = vld [vmem:[#allocation5 + $0x28] sm:$0xff]  ;;  %vm248_vm9 = vcmask 523264   ;;  %s2096_s23 = smov 96   ;;  %s2097_s24 = smov 112  }
  0x17   :  { %136 = vmatpush.msra.mxu1 %v93_v2  ;;  %v89_v5 = vld [vmem:[#allocation5 + $0x18] sm:$0xff]  ;;  %v86_v6 = vld [vmem:[#allocation5] sm:$0xff]  ;;  %v87_v8 = vld [vmem:[#allocation5 + $0x8] sm:$0xff]  ;;  %s2098_s25 = smov 32   ;;  %s2100_s28 = smov 80  }
  0x18   :  { %117 = vmatpush.msra.mxu0 %v90_v1  ;;  %v85_v7 = vld [vmem:[#allocation2] sm:$0xff]  ;;  %v2155_v13 = vld [vmem:[#allocation8 + $0x8] sm:$0xff]  ;;  %v2157_v14 = vld [vmem:[#allocation8] sm:$0xff]  ;;  %s2101_s29 = smov [#allocation10]   ;;  %s1683_s9 = sshll.u32 %s2681_s6, 4  ;;  %s1684_s9 = int_to_ptr.hbm [resolvable:$true] %s1683_s9 }
  0x19   :  { %137 = vmatpush.msra.mxu1 %v91_v4  ;;  %v94_v9 = vld [vmem:[%s2679_s4] sm:$0x3]  ;;  %v2159_v15 = vld [vmem:[#allocation7 + $0xa8] sm:$0xff]  ;;  %v2163_v16 = vld [vmem:[#allocation7 + $0xb0] sm:$0xff]  ;;  %s2094_s4 = smov 64  }
  0x1a   :  { %118 = vmatpush.msra.mxu0 %v88_v3  ;;  %v96_v10 = vperm.slane %v94_v9, 0  ;;  %260 = vmatpush.msra.mxu3 %v2159_v15  ;;  %v2165_v17 = vld [vmem:[#allocation7 + $0xb8] sm:$0xff]  ;;  %v2167_v18 = vld [vmem:[#allocation7 + $0x90] sm:$0xff]  ;;  %v2176_v21 = vld [vmem:[#allocation7 + $0xa0] sm:$0xff]  ;;  %v97_v24 = vperm.slane %v94_v9, 1 }
  0x1b   :  { %138 = vmatpush.msra.mxu1 %v89_v5  ;;  %280 = vmatpush.msra.mxu2 %v2163_v16  ;;  %v2171_v20 = vld [vmem:[#allocation7 + $0x98] sm:$0xff]  ;;  %v2194_v41 = vld [vmem:[#allocation7 + $0x80] sm:$0xff]  ;;  %v2196_v42 = vld [vmem:[#allocation7 + $0x88] sm:$0xff] }
  0x1c   :  { %119 = vmatpush.msra.mxu0 %v86_v6  ;;  %261 = vmatpush.msra.mxu3 %v2167_v18  ;;  %v2192_v40 = vld [vmem:[#allocation7 + $0x78] sm:$0xff]  ;;  %v2201_v43 = vld [vmem:[#allocation7 + $0x60] sm:$0xff]  ;;  %v2203_v44 = vld [vmem:[#allocation7 + $0x68] sm:$0xff] }
  0x1d   :  { %1695 = vmatmul.msk.f32.vlgmr.msra.gmra.mxu0 %vm100_vm0, %v85_v7  ;;  %139 = vmatpush.msra.mxu1 %v87_v8  ;;  %v2205_v45 = vld [vmem:[#allocation7 + $0x70] sm:$0xff]  ;;  %v2210_v46 = vld [vmem:[#allocation7 + $0x48] sm:$0xff]  ;;  %v2214_v48 = vld [vmem:[#allocation7 + $0x58] sm:$0xff] }
  0x1e   :  { %1696 = vmatmul.msk.f32.vlgmr.msra.gmra.mxu1 %vm100_vm0, %v85_v7  ;;  %192 = vmatpush.msrb.mxu0 %v2155_v13  ;;  %v2212_v47 = vld [vmem:[#allocation7 + $0x50] sm:$0xff]  ;;  %v2221_v51 = vld [vmem:[#allocation7 + $0x38] sm:$0xff]  ;;  %v2223_v52 = vld [vmem:[#allocation7 + $0x40] sm:$0xff] }
  0x1f   :  { %372 = vmatpush.msrb.mxu1 %v2155_v13  ;;  %281 = vmatpush.msra.mxu2 %v2171_v20  ;;  %v2217_v49 = vld [vmem:[#allocation7 + $0x30] sm:$0xff]  ;;  %v2227_v54 = vld [vmem:[#allocation7 + $0x18] sm:$0xff]  ;;  %v2230_v55 = vld [vmem:[#allocation7 + $0x20] sm:$0xff] }
  0x20   :  { %193 = vmatpush.msrb.mxu0 %v2157_v14  ;;  %262 = vmatpush.msra.mxu3 %v2192_v40  ;;  %v2232_v56 = vld [vmem:[#allocation7 + $0x28] sm:$0xff]  ;;  %v2237_v57 = vld [vmem:[#allocation7] sm:$0xff]  ;;  %v2242_v59 = vld [vmem:[#allocation7 + $0x10] sm:$0xff] }
  0x21   :  { %373 = vmatpush.msrb.mxu1 %v2157_v14  ;;  %282 = vmatpush.msra.mxu2 %v2194_v41  ;;  %v2240_v58 = vld [vmem:[#allocation7 + $0x8] sm:$0xff] }
  0x22   :  { %300 = vmatpush.msra.mxu0 %v2165_v17  ;;  %263 = vmatpush.msra.mxu3 %v2201_v43 }
  0x23   :  { %452 = vmatpush.msra.mxu1 %v2159_v15  ;;  %283 = vmatpush.msra.mxu2 %v2203_v44 }
  0x24   :  { %301 = vmatpush.msra.mxu0 %v2176_v21  ;;  %264 = vmatpush.msra.mxu3 %v2210_v46 }
  0x25   :  { %453 = vmatpush.msra.mxu1 %v2167_v18  ;;  %194 = vmatmul.f32.vlgmr.msrb.gmra.mxu0 %v2095_v50 }
  0x26   :  { %302 = vmatpush.msra.mxu0 %v2196_v42  ;;  %284 = vmatpush.msra.mxu2 %v2212_v47 }
  0x27   :  { %454 = vmatpush.msra.mxu1 %v2192_v40  ;;  %265 = vmatpush.msra.mxu3 %v2217_v49 }
  0x28   :  { %303 = vmatpush.msra.mxu0 %v2205_v45  ;;  %285 = vmatpush.msra.mxu2 %v2221_v51 }
  0x29   :  { %455 = vmatpush.msra.mxu1 %v2201_v43  ;;  %266 = vmatpush.msra.mxu3 %v2227_v54 }
  0x2a   :  { %304 = vmatpush.msra.mxu0 %v2214_v48  ;;  %286 = vmatpush.msra.mxu2 %v2230_v55 }
  0x2b   :  { %456 = vmatpush.msra.mxu1 %v2210_v46  ;;  %267 = vmatpush.msra.mxu3 %v2237_v57 }
  0x2c   :  { %305 = vmatpush.msra.mxu0 %v2223_v52  ;;  %287 = vmatpush.msra.mxu2 %v2240_v58 }
  0x2d   :  { %457 = vmatpush.msra.mxu1 %v2217_v49  ;;  %472 = vmatpush.msrb.mxu3 %v2163_v16 }
  0x2e   :  { %306 = vmatpush.msra.mxu0 %v2232_v56  ;;  %492 = vmatpush.msrb.mxu2 %v2165_v17 }
  0x2f   :  { %458 = vmatpush.msra.mxu1 %v2227_v54  ;;  %473 = vmatpush.msrb.mxu3 %v2171_v20 }
  0x30   :  { %307 = vmatpush.msra.mxu0 %v2242_v59  ;;  %493 = vmatpush.msrb.mxu2 %v2176_v21 }
  0x31   :  { %459 = vmatpush.msra.mxu1 %v2237_v57  ;;  %474 = vmatpush.msrb.mxu3 %v2194_v41 }
  0x32   :  { %567 = vmatpush.msrb.mxu0 %v2155_v13  ;;  %494 = vmatpush.msrb.mxu2 %v2196_v42 }
  0x33   :  { %475 = vmatpush.msrb.mxu3 %v2203_v44 }
  0x34   :  { %568 = vmatpush.msrb.mxu0 %v2157_v14  ;;  %495 = vmatpush.msrb.mxu2 %v2205_v45 }
  0x35   :  { %476 = vmatpush.msrb.mxu3 %v2212_v47 }
  0x36   :  { %496 = vmatpush.msrb.mxu2 %v2214_v48 }
  0x37   :  { %477 = vmatpush.msrb.mxu3 %v2221_v51 }
  0x38   :  { %497 = vmatpush.msrb.mxu2 %v2223_v52 }
  0x39   :  { %478 = vmatpush.msrb.mxu3 %v2230_v55 }
  0x3a   :  { %498 = vmatpush.msrb.mxu2 %v2232_v56 }
  0x3b   :  { %479 = vmatpush.msrb.mxu3 %v2240_v58 }
  0x3c   :  { %499 = vmatpush.msrb.mxu2 %v2242_v59 }
  0x9a   :  { %v121_v11 = vpop.f32.mrf.mxu0 }
  0x9b   :  { %v2153_v12 = vadd.f32 %v121_v11, %v96_v10  ;;  %v141_v25 = vpop.f32.mrf.mxu1 }
  0x9c   :  { %v2184_v27 = vadd.f32 %v141_v25, %v97_v24 }
  0x9d   :  { %v1697_v19 = vmul.f32 -1.442695, %v2153_v12 }
  0x9e   :  { %v1698_v39 = vmul.f32 -1.442695, %v2184_v27 }
  0x9f   :  { %1769 = vpow2.f32 %v1697_v19 }
  0xa2   :  { %v195_v19 = vpop.f32.mrf.mxu0 }
  0xa5   :  { %v1770_v22 = vpop.eup %1769 }
  0xa6   :  { %v206_v23 = vadd.f32 1.0, %v1770_v22  ;;  %v2298_v22 = vld [vmem:[%s2680_s5] ss:$0 sm:$0xff] }
  0xa8   :  { %1771 = vrcp.f32 %v206_v23  ;;  %v219_v30 = vand.u32 2147483648, %v206_v23  ;;  %v217_v32 = vand.u32 2147483647, %v206_v23  ;;  %vm213_vm2 = vweird.f32 %v206_v23 }
  0xa9   :  { %1773 = vtanh.f32 %v2184_v27 }
  0xaa   :  { %v220_v35 = vor.u32 1.1754944e-38, %v219_v30  ;;  %vm218_vm4 = vcmp.eq.f32.partialorder %v217_v32, 8.507059e+37  ;;  %1775 = vpow2.f32 %v1698_v39 }
  0xae   :  { %v1772_v26 = vpop.eup %1771 }
  0xaf   :  { %v209_v28 = vmul.f32 %v1772_v26, %v206_v23  ;;  %vm214_vm1 = vweird.f32 %v1772_v26  ;;  %v1774_v34 = vpop.eup %1773 }
  0xb0   :  { %vm215_vm3 = vmor %vm213_vm2, %vm214_vm1  ;;  %v1776_v53 = vpop.eup %1775 }
  0xb1   :  { %v210_v29 = vsub.f32 1.0, %v209_v28  ;;  %v207_v60 = vadd.f32 1.0, %v1776_v53 }
  0xb3   :  { %v211_v31 = vmul.f32 %v1772_v26, %v210_v29  ;;  %1777 = vrcp.f32 %v207_v60  ;;  %vm228_vm5 = vweird.f32 %v207_v60  ;;  %v234_v4 = vand.u32 2147483648, %v207_v60 }
  0xb4   :  { %v232_v6 = vand.u32 2147483647, %v207_v60 }
  0xb5   :  { %v212_v33 = vadd.f32 %v1772_v26, %v211_v31  ;;  %v235_v7 = vor.u32 1.1754944e-38, %v234_v4 }
  0xb6   :  { %vm233_vm8 = vcmp.eq.f32.partialorder %v232_v6, 8.507059e+37 }
  0xb7   :  { %v216_v36 = vsel %vm215_vm3, %v1772_v26, %v212_v33 }
  0xb8   :  { %v2187_v37 = vsel %vm218_vm4, %v220_v35, %v216_v36 }
  0xb9   :  { %v240_v38 = vmul.f32 %v1774_v34, %v2187_v37  ;;  %v1778_v61 = vpop.eup %1777  ;;  %v239_v1 = vmul.f32 0.0, %v2187_v37 }
  0xba   :  { %v224_v62 = vmul.f32 %v1778_v61, %v207_v60  ;;  %vm229_vm6 = vweird.f32 %v1778_v61 }
  0xbb   :  { %242 = vrot.lane.b32.xlu0 %v240_v38, %s2094_s4  ;;  %vm230_vm7 = vmor %vm228_vm5, %vm229_vm6  ;;  %vm174_vm6 = vcmask 130048  }
  0xbc   :  { %v225_v63 = vsub.f32 1.0, %v224_v62 }
  0xbe   :  { %v226_v0 = vmul.f32 %v1778_v61, %v225_v63 }
  0xc0   :  { %v227_v5 = vadd.f32 %v1778_v61, %v226_v0 }
  0xc2   :  { %v231_v8 = vsel %vm230_vm7, %v1778_v61, %v227_v5 }
  0xc3   :  { %v236_v10 = vsel %vm233_vm8, %v235_v7, %v231_v8 }
 0x12d   :  { %v243_v2 = vpop.permute.xlu0 %242 }
 0x12e   :  { %v2271_v3 = vadd.f32 %v243_v2, %v239_v1 }
 0x130   :  { %1779 = vtanh.f32 %v2271_v3 }
 0x136   :  { %v1780_v9 = vpop.eup %1779 }
 0x137   :  { %v247_v11 = vmul.f32 %v1780_v9, %v236_v10 }
 0x139   :  { %1699 = vmatmul.msk.f32.vlgmr.msra.gmra.mxu3 %vm248_vm9, %v247_v11  ;;  %1700 = vmatmul.msk.f32.vlgmr.msra.gmra.mxu2 %vm248_vm9, %v247_v11 }
 0x13a   :  { %1701 = vmatmul.msk.f32.vlgmr.msra.gmra.mxu0 %vm248_vm9, %v247_v11  ;;  %687 = vmatpush.msra.mxu3 %v2165_v17 }
 0x13b   :  { %647 = vmatpush.msra.mxu0 %v2159_v15  ;;  %759 = vmatpush.msra.mxu2 %v2155_v13 }
 0x13c   :  { %688 = vmatpush.msra.mxu3 %v2176_v21 }
 0x13d   :  { %648 = vmatpush.msra.mxu0 %v2167_v18  ;;  %760 = vmatpush.msra.mxu2 %v2157_v14 }
 0x13e   :  { %689 = vmatpush.msra.mxu3 %v2196_v42 }
 0x13f   :  { %649 = vmatpush.msra.mxu0 %v2192_v40 }
 0x140   :  { %690 = vmatpush.msra.mxu3 %v2205_v45 }
 0x141   :  { %650 = vmatpush.msra.mxu0 %v2201_v43 }
 0x142   :  { %691 = vmatpush.msra.mxu3 %v2214_v48 }
 0x143   :  { %651 = vmatpush.msra.mxu0 %v2210_v46 }
 0x144   :  { %692 = vmatpush.msra.mxu3 %v2223_v52 }
 0x145   :  { %652 = vmatpush.msra.mxu0 %v2217_v49 }
 0x146   :  { %693 = vmatpush.msra.mxu3 %v2232_v56 }
 0x147   :  { %653 = vmatpush.msra.mxu0 %v2227_v54 }
 0x148   :  { %694 = vmatpush.msra.mxu3 %v2242_v59 }
 0x149   :  { %654 = vmatpush.msra.mxu0 %v2237_v57 }
 0x1b7   :  { %v309_v28 = vpop.f32.mrf.mxu0 }
 0x1bc   :  { %v269_v23 = vpop.f32.mrf.mxu3  ;;  %v289_v24 = vpop.f32.mrf.mxu2 }
 0x1bd   :  { %v312_v25 = vadd.f32 %v269_v23, %v195_v19  ;;  %383 = vrot.lane.b32.xlu2 %v289_v24, %s2094_s4 }
 0x1bf   :  { %v313_v26 = vadd.f32 %v2298_v22, %v312_v25 }
 0x1c1   :  { %1781 = vtanh.f32 %v313_v26  ;;  %v1702_v30 = vmul.f32 -1.442695, %v313_v26 }
 0x1c3   :  { %1783 = vpow2.f32 %v1702_v30 }
 0x1c5   :  { %385 = vrot.lane.b32.xlu2 %v309_v28, %s2094_s4 }
 0x1c7   :  { %v1782_v29 = vpop.eup %1781 }
 0x1c8   :  { %336 = vrot.lane.b32.xlu0 %v1782_v29, %s2096_s23 }
 0x1c9   :  { %v1784_v31 = vpop.eup %1783 }
 0x1ca   :  { %v317_v32 = vadd.f32 1.0, %v1784_v31 }
 0x1cc   :  { %1785 = vrcp.f32 %v317_v32  ;;  %v329_v38 = vand.u32 2147483648, %v317_v32  ;;  %vm323_vm11 = vweird.f32 %v317_v32  ;;  %v327_v39 = vand.u32 2147483647, %v317_v32 }
 0x1ce   :  { %v330_v53 = vor.u32 1.1754944e-38, %v329_v38  ;;  %vm328_vm13 = vcmp.eq.f32.partialorder %v327_v39, 8.507059e+37 }
 0x1d2   :  { %v1786_v33 = vpop.eup %1785 }
 0x1d3   :  { %v319_v34 = vmul.f32 %v1786_v33, %v317_v32  ;;  %vm324_vm10 = vweird.f32 %v1786_v33 }
 0x1d4   :  { %vm325_vm12 = vmor %vm323_vm11, %vm324_vm10 }
 0x1d5   :  { %v320_v35 = vsub.f32 1.0, %v319_v34 }
 0x1d7   :  { %v321_v36 = vmul.f32 %v1786_v33, %v320_v35 }
 0x1d9   :  { %v322_v37 = vadd.f32 %v1786_v33, %v321_v36 }
 0x1db   :  { %v326_v50 = vsel %vm325_vm12, %v1786_v33, %v322_v37 }
 0x1dc   :  { %v331_v61 = vsel %vm328_vm13, %v330_v53, %v326_v50 }
 0x1dd   :  { %v334_v63 = vmul.f32 0.0, %v331_v61 }
 0x217   :  { %v384_v2 = vpop.permute.xlu2 %383 }
 0x21f   :  { %v386_v11 = vpop.permute.xlu2 %385 }
 0x220   :  { %v388_v19 = vsel %vm248_vm9, %v384_v2, %v386_v11 }
 0x221   :  { %v392_v24 = vadd.f32 %v388_v19, %v2184_v27 }
 0x223   :  { %v1705_v37 = vmul.f32 -1.442695, %v392_v24 }
 0x23a   :  { %v337_v60 = vpop.permute.xlu0 %336 }
 0x23b   :  { %v339_v62 = vmul.f32 %v337_v60, %v331_v61 }
 0x23d   :  { %341 = vrot.lane.b32.xlu1 %v339_v62, %s2097_s24 }
 0x245   :  { %381 = vrot.lane.b32.xlu1 %v269_v23, %s2094_s4 }
 0x2af   :  { %v342_v0 = vpop.permute.xlu1 %341 }
 0x2b0   :  { %v2306_v1 = vadd.f32 %v342_v0, %v334_v63 }
 0x2b2   :  { %1787 = vtanh.f32 %v2306_v1 }
 0x2b7   :  { %v382_v4 = vpop.permute.xlu1 %381 }
 0x2b8   :  { %v1788_v5 = vpop.eup %1787  ;;  %v387_v6 = vsel %vm248_vm9, %v382_v4, %v384_v2 }
 0x2b9   :  { %v391_v7 = vadd.f32 %v387_v6, %v2153_v12  ;;  %347 = vrot.lane.b32.xlu0 %v1788_v5, %s2098_s25 }
 0x2bb   :  { %v1704_v8 = vmul.f32 -1.442695, %v391_v7 }
 0x2bd   :  { %1789 = vpow2.f32 %v1704_v8 }
 0x2c3   :  { %v1790_v9 = vpop.eup %1789 }
 0x2c4   :  { %v399_v10 = vadd.f32 1.0, %v1790_v9 }
 0x2c6   :  { %1791 = vrcp.f32 %v399_v10  ;;  %v412_v28 = vand.u32 2147483648, %v399_v10  ;;  %v410_v30 = vand.u32 2147483647, %v399_v10  ;;  %vm406_vm15 = vweird.f32 %v399_v10 }
 0x2c7   :  { %1793 = vtanh.f32 %v392_v24 }
 0x2c8   :  { %v413_v32 = vor.u32 1.1754944e-38, %v412_v28  ;;  %vm411_vm1 = vcmp.eq.f32.partialorder %v410_v30, 8.507059e+37  ;;  %1795 = vpow2.f32 %v1705_v37 }
 0x2cc   :  { %v1792_v23 = vpop.eup %1791 }
 0x2cd   :  { %v402_v25 = vmul.f32 %v1792_v23, %v399_v10  ;;  %vm407_vm14 = vweird.f32 %v1792_v23  ;;  %v1794_v34 = vpop.eup %1793 }
 0x2ce   :  { %vm408_vm0 = vmor %vm406_vm15, %vm407_vm14  ;;  %v1796_v50 = vpop.eup %1795 }
 0x2cf   :  { %v403_v26 = vsub.f32 1.0, %v402_v25  ;;  %v400_v53 = vadd.f32 1.0, %v1796_v50 }
 0x2d1   :  { %v404_v29 = vmul.f32 %v1792_v23, %v403_v26  ;;  %1797 = vrcp.f32 %v400_v53  ;;  %v427_v7 = vand.u32 2147483648, %v400_v53  ;;  %vm421_vm3 = vweird.f32 %v400_v53 }
 0x2d3   :  { %v405_v31 = vadd.f32 %v1792_v23, %v404_v29  ;;  %v428_v9 = vor.u32 1.1754944e-38, %v427_v7 }
 0x2d5   :  { %v409_v33 = vsel %vm408_vm0, %v1792_v23, %v405_v31 }
 0x2d6   :  { %v414_v35 = vsel %vm411_vm1, %v413_v32, %v409_v33 }
 0x2d7   :  { %v433_v36 = vmul.f32 %v1794_v34, %v414_v35  ;;  %v1798_v60 = vpop.eup %1797  ;;  %v432_v2 = vmul.f32 %v414_v35, %v2271_v3 }
 0x2d8   :  { %v417_v62 = vmul.f32 %v1798_v60, %v400_v53  ;;  %vm422_vm2 = vweird.f32 %v1798_v60 }
 0x2d9   :  { %435 = vrot.lane.b32.xlu1 %v433_v36, %s2094_s4  ;;  %vm423_vm4 = vmor %vm421_vm3, %vm422_vm2 }
 0x2da   :  { %v418_v63 = vsub.f32 1.0, %v417_v62 }
 0x2dc   :  { %v419_v0 = vmul.f32 %v1798_v60, %v418_v63 }
 0x2de   :  { %v420_v6 = vadd.f32 %v1798_v60, %v419_v0 }
 0x2e0   :  { %v424_v8 = vsel %vm423_vm4, %v1798_v60, %v420_v6 }
 0x32b   :  { %v348_v38 = vpop.permute.xlu0 %347 }
 0x32c   :  { %v350_v39 = vmul.f32 %v348_v38, %v331_v61  ;;  %v425_v61 = vand.u32 2147483647, %v400_v53 }
 0x32e   :  { %352 = vrot.lane.b32.xlu2 %v350_v39, %s2096_s23  ;;  %vm426_vm5 = vcmp.eq.f32.partialorder %v425_v61, 8.507059e+37 }
 0x32f   :  { %v429_v11 = vsel %vm426_vm5, %v428_v9, %v424_v8 }
 0x34b   :  { %v436_v4 = vpop.permute.xlu1 %435 }
 0x34c   :  { %v2317_v5 = vadd.f32 %v436_v4, %v432_v2 }
 0x34e   :  { %1799 = vtanh.f32 %v2317_v5 }
 0x354   :  { %v1800_v10 = vpop.eup %1799 }
 0x355   :  { %v440_v19 = vmul.f32 %v1800_v10, %v429_v11 }
 0x357   :  { %1707 = vmatmul.msk.f32.vlgmr.msrb.gmra.mxu3 %vm248_vm9, %v440_v19  ;;  %1708 = vmatmul.msk.f32.vlgmr.msrb.gmra.mxu2 %vm248_vm9, %v440_v19 }
 0x358   :  { %839 = vmatpush.msrb.mxu2 %v2159_v15  ;;  %954 = vmatpush.msrb.mxu3 %v2155_v13 }
 0x35a   :  { %840 = vmatpush.msrb.mxu2 %v2167_v18  ;;  %955 = vmatpush.msrb.mxu3 %v2157_v14 }
 0x35c   :  { %841 = vmatpush.msrb.mxu2 %v2192_v40 }
 0x35e   :  { %842 = vmatpush.msrb.mxu2 %v2201_v43 }
 0x360   :  { %843 = vmatpush.msrb.mxu2 %v2210_v46 }
 0x362   :  { %844 = vmatpush.msrb.mxu2 %v2217_v49 }
 0x364   :  { %845 = vmatpush.msrb.mxu2 %v2227_v54 }
 0x366   :  { %846 = vmatpush.msrb.mxu2 %v2237_v57 }
 0x388   :  { %v353_v3 = vpop.permute.xlu2 %352 }
 0x389   :  { %355 = vst.msk [vmem:[#allocation10] sm:$0xff] %vm174_vm6, %v353_v3  ;;  %1703 = vmatmul.msk.f32.vlgmr.msrb.gmra.mxu1 %vm174_vm6, %v353_v3 }
 0x38a   :  { %667 = vmatpush.msrb.mxu1 %v2163_v16 }
 0x38c   :  { %668 = vmatpush.msrb.mxu1 %v2171_v20 }
 0x38e   :  { %669 = vmatpush.msrb.mxu1 %v2194_v41 }
 0x390   :  { %670 = vmatpush.msrb.mxu1 %v2203_v44 }
 0x391   :  { %1706 = vmatmul.msk.f32.vlgmr.msra.gmra.mxu1 %vm248_vm9, %v440_v19 }
 0x392   :  { %671 = vmatpush.msrb.mxu1 %v2212_v47 }
 0x394   :  { %672 = vmatpush.msrb.mxu1 %v2221_v51 }
 0x396   :  { %673 = vmatpush.msrb.mxu1 %v2230_v55 }
 0x398   :  { %674 = vmatpush.msrb.mxu1 %v2240_v58 }
 0x39a   :  { %879 = vmatpush.msra.mxu1 %v2165_v17 }
 0x39c   :  { %880 = vmatpush.msra.mxu1 %v2176_v21 }
 0x39e   :  { %881 = vmatpush.msra.mxu1 %v2196_v42 }
 0x3a0   :  { %882 = vmatpush.msra.mxu1 %v2205_v45 }
 0x3a2   :  { %883 = vmatpush.msra.mxu1 %v2214_v48 }
 0x3a4   :  { %884 = vmatpush.msra.mxu1 %v2223_v52 }
 0x3a6   :  { %885 = vmatpush.msra.mxu1 %v2232_v56 }
 0x3a8   :  { %886 = vmatpush.msra.mxu1 %v2242_v59 }
 0x3da   :  { %v481_v29 = vpop.f32.mrf.mxu3  ;;  %v501_v0 = vpop.f32.mrf.mxu2 }
 0x406   :  { %v375_v23 = vpop.f32.mrf.mxu1 }
 0x40e   :  { %v461_v24 = vpop.f32.mrf.mxu1 }
 0x40f   :  { %v504_v25 = vadd.f32 %v461_v24, %v375_v23  ;;  %576 = vrot.lane.b32.xlu2 %v461_v24, %s2094_s4 }
 0x411   :  { %v505_v26 = vadd.f32 %v2298_v22, %v504_v25 }
 0x413   :  { %1801 = vtanh.f32 %v505_v26  ;;  %v1709_v30 = vmul.f32 -1.442695, %v505_v26 }
 0x415   :  { %1803 = vpow2.f32 %v1709_v30 }
 0x419   :  { %v1802_v28 = vpop.eup %1801 }
 0x41a   :  { %528 = vrot.lane.b32.xlu0 %v1802_v28, %s2096_s23 }
 0x41b   :  { %v1804_v31 = vpop.eup %1803 }
 0x41c   :  { %v509_v32 = vadd.f32 1.0, %v1804_v31 }
 0x41e   :  { %1805 = vrcp.f32 %v509_v32  ;;  %v521_v38 = vand.u32 2147483648, %v509_v32  ;;  %vm515_vm8 = vweird.f32 %v509_v32  ;;  %v519_v39 = vand.u32 2147483647, %v509_v32 }
 0x420   :  { %v522_v53 = vor.u32 1.1754944e-38, %v521_v38  ;;  %vm520_vm11 = vcmp.eq.f32.partialorder %v519_v39, 8.507059e+37 }
 0x422   :  { %578 = vrot.lane.b32.xlu0 %v481_v29, %s2094_s4 }
 0x424   :  { %v1806_v33 = vpop.eup %1805 }
 0x425   :  { %v511_v34 = vmul.f32 %v1806_v33, %v509_v32  ;;  %vm516_vm7 = vweird.f32 %v1806_v33 }
 0x426   :  { %vm517_vm10 = vmor %vm515_vm8, %vm516_vm7 }
 0x427   :  { %v512_v35 = vsub.f32 1.0, %v511_v34 }
 0x429   :  { %v513_v36 = vmul.f32 %v1806_v33, %v512_v35 }
 0x42b   :  { %v514_v37 = vadd.f32 %v1806_v33, %v513_v36 }
 0x42d   :  { %v518_v50 = vsel %vm517_vm10, %v1806_v33, %v514_v37 }
 0x42e   :  { %v523_v62 = vsel %vm520_vm11, %v522_v53, %v518_v50 }
 0x42f   :  { %v526_v11 = vmul.f32 %v523_v62, %v2306_v1 }
 0x469   :  { %v577_v4 = vpop.permute.xlu2 %576 }
 0x48c   :  { %v529_v60 = vpop.permute.xlu0 %528 }
 0x48d   :  { %v531_v63 = vmul.f32 %v529_v60, %v523_v62 }
 0x48f   :  { %533 = vrot.lane.b32.xlu1 %v531_v63, %s2097_s24 }
 0x494   :  { %v579_v2 = vpop.permute.xlu0 %578 }
 0x495   :  { %v582_v6 = vsel %vm248_vm9, %v577_v4, %v579_v2 }
 0x496   :  { %v586_v7 = vadd.f32 %v582_v6, %v2153_v12 }
 0x497   :  { %580 = vrot.lane.b32.xlu1 %v501_v0, %s2094_s4 }
 0x498   :  { %v1711_v61 = vmul.f32 -1.442695, %v586_v7 }
 0x49a   :  { %1807 = vpow2.f32 %v1711_v61 }
 0x4a0   :  { %v1808_v8 = vpop.eup %1807 }
 0x4a1   :  { %v594_v9 = vadd.f32 1.0, %v1808_v8 }
 0x4a3   :  { %1809 = vrcp.f32 %v594_v9  ;;  %v607_v1 = vand.u32 2147483648, %v594_v9  ;;  %vm601_vm13 = vweird.f32 %v594_v9  ;;  %v605_v32 = vand.u32 2147483647, %v594_v9 }
 0x4a5   :  { %v608_v34 = vor.u32 1.1754944e-38, %v607_v1  ;;  %vm606_vm15 = vcmp.eq.f32.partialorder %v605_v32, 8.507059e+37 }
 0x4a9   :  { %v1810_v10 = vpop.eup %1809 }
 0x4aa   :  { %v597_v19 = vmul.f32 %v1810_v10, %v594_v9  ;;  %vm602_vm12 = vweird.f32 %v1810_v10 }
 0x4ab   :  { %vm603_vm14 = vmor %vm601_vm13, %vm602_vm12 }
 0x4ac   :  { %v598_v24 = vsub.f32 1.0, %v597_v19 }
 0x4ae   :  { %v599_v25 = vmul.f32 %v1810_v10, %v598_v24 }
 0x4b0   :  { %v600_v31 = vadd.f32 %v1810_v10, %v599_v25 }
 0x4b2   :  { %v604_v33 = vsel %vm603_vm14, %v1810_v10, %v600_v31 }
 0x4b3   :  { %v609_v36 = vsel %vm606_vm15, %v608_v34, %v604_v33 }
 0x4b4   :  { %v627_v6 = vmul.f32 %v609_v36, %v2317_v5 }
 0x501   :  { %v534_v3 = vpop.permute.xlu1 %533 }
 0x502   :  { %v2360_v23 = vadd.f32 %v534_v3, %v526_v11 }
 0x504   :  { %1811 = vtanh.f32 %v2360_v23 }
 0x509   :  { %v581_v26 = vpop.permute.xlu1 %580 }
 0x50a   :  { %v1812_v28 = vpop.eup %1811  ;;  %v583_v29 = vsel %vm248_vm9, %v579_v2, %v581_v26 }
 0x50b   :  { %v587_v30 = vadd.f32 %v583_v29, %v2184_v27  ;;  %539 = vrot.lane.b32.xlu2 %v1812_v28, %s2098_s25 }
 0x50d   :  { %1813 = vtanh.f32 %v587_v30  ;;  %v1712_v38 = vmul.f32 -1.442695, %v587_v30 }
 0x50f   :  { %1815 = vpow2.f32 %v1712_v38 }
 0x513   :  { %v1814_v35 = vpop.eup %1813 }
 0x514   :  { %v628_v37 = vmul.f32 %v1814_v35, %v609_v36 }
 0x515   :  { %v1816_v53 = vpop.eup %1815 }
 0x516   :  { %630 = vrot.lane.b32.xlu0 %v628_v37, %s2094_s4  ;;  %v595_v60 = vadd.f32 1.0, %v1816_v53 }
 0x518   :  { %1817 = vrcp.f32 %v595_v60  ;;  %vm616_vm1 = vweird.f32 %v595_v60  ;;  %v620_v9 = vand.u32 2147483647, %v595_v60 }
 0x51a   :  { %vm621_vm3 = vcmp.eq.f32.partialorder %v620_v9, 8.507059e+37 }
 0x51e   :  { %v1818_v63 = vpop.eup %1817 }
 0x51f   :  { %v612_v0 = vmul.f32 %v1818_v63, %v595_v60  ;;  %vm617_vm0 = vweird.f32 %v1818_v63 }
 0x520   :  { %vm618_vm2 = vmor %vm616_vm1, %vm617_vm0 }
 0x521   :  { %v613_v2 = vsub.f32 1.0, %v612_v0 }
 0x523   :  { %v614_v4 = vmul.f32 %v1818_v63, %v613_v2 }
 0x525   :  { %v615_v8 = vadd.f32 %v1818_v63, %v614_v4 }
 0x527   :  { %v619_v10 = vsel %vm618_vm2, %v1818_v63, %v615_v8 }
 0x565   :  { %v540_v39 = vpop.permute.xlu2 %539 }
 0x566   :  { %v2367_v50 = vmul.f32 %v540_v39, %v523_v62  ;;  %v622_v62 = vand.u32 2147483648, %v595_v60 }
 0x568   :  { %549 = vrot.lane.b32.xlu1 %v2367_v50, %s2096_s23  ;;  %v623_v11 = vor.u32 1.1754944e-38, %v622_v62 }
 0x56a   :  { %v624_v3 = vsel %vm621_vm3, %v623_v11, %v619_v10 }
 0x588   :  { %v631_v7 = vpop.permute.xlu0 %630 }
 0x589   :  { %v2372_v61 = vadd.f32 %v631_v7, %v627_v6 }
 0x58b   :  { %1819 = vtanh.f32 %v2372_v61 }
 0x591   :  { %v1820_v19 = vpop.eup %1819 }
 0x592   :  { %v635_v24 = vmul.f32 %v1820_v19, %v624_v3 }
 0x594   :  { %1714 = vmatmul.msk.f32.vlgmr.msrb.gmra.mxu1 %vm248_vm9, %v635_v24  ;;  %1715 = vmatmul.msk.f32.vlgmr.msra.gmra.mxu3 %vm248_vm9, %v635_v24 }
 0x595   :  { %1034 = vmatpush.msra.mxu3 %v2159_v15  ;;  %1149 = vmatpush.msrb.mxu1 %v2155_v13 }
 0x597   :  { %1035 = vmatpush.msra.mxu3 %v2167_v18  ;;  %1150 = vmatpush.msrb.mxu1 %v2157_v14 }
 0x599   :  { %1036 = vmatpush.msra.mxu3 %v2192_v40 }
 0x59b   :  { %1037 = vmatpush.msra.mxu3 %v2201_v43 }
 0x59d   :  { %1038 = vmatpush.msra.mxu3 %v2210_v46 }
 0x59f   :  { %1039 = vmatpush.msra.mxu3 %v2217_v49 }
 0x5a1   :  { %1040 = vmatpush.msra.mxu3 %v2227_v54 }
 0x5a3   :  { %1041 = vmatpush.msra.mxu3 %v2237_v57 }
 0x5da   :  { %v550_v5 = vpop.permute.xlu1 %549 }
 0x5db   :  { %1710 = vmatmul.msk.f32.vlgmr.msrb.gmra.mxu0 %vm174_vm6, %v550_v5 }
 0x5dc   :  { %859 = vmatpush.msrb.mxu0 %v2163_v16 }
 0x5de   :  { %860 = vmatpush.msrb.mxu0 %v2171_v20 }
 0x5e0   :  { %861 = vmatpush.msrb.mxu0 %v2194_v41 }
 0x5e2   :  { %862 = vmatpush.msrb.mxu0 %v2203_v44 }
 0x5e3   :  { %1713 = vmatmul.msk.f32.vlgmr.msra.gmra.mxu0 %vm248_vm9, %v635_v24 }
 0x5e4   :  { %863 = vmatpush.msrb.mxu0 %v2212_v47 }
 0x5e6   :  { %864 = vmatpush.msrb.mxu0 %v2221_v51 }
 0x5e8   :  { %865 = vmatpush.msrb.mxu0 %v2230_v55 }
 0x5ea   :  { %866 = vmatpush.msrb.mxu0 %v2240_v58 }
 0x5ec   :  { %1074 = vmatpush.msra.mxu0 %v2165_v17 }
 0x5ee   :  { %1075 = vmatpush.msra.mxu0 %v2176_v21 }
 0x5f0   :  { %1076 = vmatpush.msra.mxu0 %v2196_v42 }
 0x5f2   :  { %1077 = vmatpush.msra.mxu0 %v2205_v45 }
 0x5f4   :  { %1078 = vmatpush.msra.mxu0 %v2214_v48 }
 0x5f6   :  { %1079 = vmatpush.msra.mxu0 %v2223_v52 }
 0x5f8   :  { %1080 = vmatpush.msra.mxu0 %v2232_v56 }
 0x5fa   :  { %1081 = vmatpush.msra.mxu0 %v2242_v59 }
 0x611   :  { %v676_v18 = vpop.f32.mrf.mxu1 }
 0x617   :  { %v696_v38 = vpop.f32.mrf.mxu3 }
 0x658   :  { %v570_v13 = vpop.f32.mrf.mxu0 }
 0x660   :  { %v656_v14 = vpop.f32.mrf.mxu0 }
 0x661   :  { %v699_v15 = vadd.f32 %v656_v14, %v570_v13  ;;  %768 = vrot.lane.b32.xlu1 %v656_v14, %s2094_s4 }
 0x663   :  { %v700_v16 = vadd.f32 %v2298_v22, %v699_v15 }
 0x665   :  { %1821 = vtanh.f32 %v700_v16  ;;  %v1716_v20 = vmul.f32 -1.442695, %v700_v16 }
 0x667   :  { %1823 = vpow2.f32 %v1716_v20 }
 0x66b   :  { %v1822_v17 = vpop.eup %1821 }
 0x66c   :  { %723 = vrot.lane.b32.xlu2 %v1822_v17, %s2096_s23 }
 0x66d   :  { %v1824_v21 = vpop.eup %1823 }
 0x66e   :  { %v704_v25 = vadd.f32 1.0, %v1824_v21 }
 0x670   :  { %1825 = vrcp.f32 %v704_v25  ;;  %v716_v1 = vand.u32 2147483648, %v704_v25  ;;  %vm710_vm5 = vweird.f32 %v704_v25  ;;  %v714_v32 = vand.u32 2147483647, %v704_v25 }
 0x672   :  { %v717_v34 = vor.u32 1.1754944e-38, %v716_v1  ;;  %vm715_vm8 = vcmp.eq.f32.partialorder %v714_v32, 8.507059e+37 }
 0x674   :  { %770 = vrot.lane.b32.xlu2 %v676_v18, %s2094_s4 }
 0x676   :  { %v1826_v26 = vpop.eup %1825 }
 0x677   :  { %v706_v28 = vmul.f32 %v1826_v26, %v704_v25  ;;  %vm711_vm4 = vweird.f32 %v1826_v26 }
 0x678   :  { %vm712_vm7 = vmor %vm710_vm5, %vm711_vm4 }
 0x679   :  { %v707_v29 = vsub.f32 1.0, %v706_v28 }
 0x67b   :  { %v708_v30 = vmul.f32 %v1826_v26, %v707_v29 }
 0x67d   :  { %v709_v31 = vadd.f32 %v1826_v26, %v708_v30 }
 0x67f   :  { %v713_v33 = vsel %vm712_vm7, %v1826_v26, %v709_v31 }
 0x680   :  { %v2409_v36 = vsel %vm715_vm8, %v717_v34, %v713_v33 }
 0x681   :  { %v721_v7 = vmul.f32 %v2409_v36, %v2360_v23 }
 0x6c6   :  { %v724_v35 = vpop.permute.xlu2 %723 }
 0x6c7   :  { %v726_v37 = vmul.f32 %v724_v35, %v2409_v36 }
 0x6c9   :  { %728 = vrot.lane.b32.xlu0 %v726_v37, %s2097_s24 }
 0x6ce   :  { %v771_v53 = vpop.permute.xlu2 %770 }
 0x6d1   :  { %772 = vrot.lane.b32.xlu0 %v696_v38, %s2094_s4 }
 0x6d3   :  { %v769_v39 = vpop.permute.xlu1 %768 }
 0x6d4   :  { %v774_v60 = vsel %vm248_vm9, %v769_v39, %v771_v53 }
 0x6d5   :  { %v778_v63 = vadd.f32 %v774_v60, %v2153_v12 }
 0x6d7   :  { %v1718_v0 = vmul.f32 -1.442695, %v778_v63 }
 0x6d9   :  { %1827 = vpow2.f32 %v1718_v0  ;;  %v2431_v0 = vld [vmem:[#allocation7 + $0xa8] sm:$0xff] }
 0x6df   :  { %v1828_v2 = vpop.eup %1827 }
 0x6e0   :  { %v786_v4 = vadd.f32 1.0, %v1828_v2  ;;  %v2434_v2 = vld [vmem:[#allocation8 + $0x8] sm:$0xff] }
 0x6e2   :  { %1829 = vrcp.f32 %v786_v4  ;;  %v799_v23 = vand.u32 2147483648, %v786_v4  ;;  %vm793_vm11 = vweird.f32 %v786_v4  ;;  %v797_v14 = vand.u32 2147483647, %v786_v4 }
 0x6e4   :  { %v800_v16 = vor.u32 1.1754944e-38, %v799_v23  ;;  %vm798_vm13 = vcmp.eq.f32.partialorder %v797_v14, 8.507059e+37 }
 0x6e8   :  { %v1830_v6 = vpop.eup %1829 }
 0x6e9   :  { %v789_v8 = vmul.f32 %v1830_v6, %v786_v4  ;;  %vm794_vm10 = vweird.f32 %v1830_v6 }
 0x6ea   :  { %vm795_vm12 = vmor %vm793_vm11, %vm794_vm10 }
 0x6eb   :  { %v790_v10 = vsub.f32 1.0, %v789_v8  ;;  %v2455_v8 = vld [vmem:[#allocation7 + $0xb0] sm:$0xff] }
 0x6ed   :  { %v791_v11 = vmul.f32 %v1830_v6, %v790_v10 }
 0x6ef   :  { %v792_v13 = vadd.f32 %v1830_v6, %v791_v11 }
 0x6f1   :  { %v796_v15 = vsel %vm795_vm12, %v1830_v6, %v792_v13  ;;  %v2440_v6 = vld [vmem:[#allocation7 + $0x90] sm:$0xff] }
 0x6f2   :  { %v801_v18 = vsel %vm798_vm13, %v800_v16, %v796_v15 }
 0x6f3   :  { %v819_v1 = vmul.f32 %v801_v18, %v2372_v61 }
 0x73b   :  { %v729_v62 = vpop.permute.xlu0 %728 }
 0x73c   :  { %v2418_v9 = vadd.f32 %v729_v62, %v721_v7  ;;  %v2443_v7 = vld [vmem:[#allocation8] sm:$0xff]  ;;  %v2458_v62 = vld [vmem:[#allocation7 + $0x98] sm:$0xff] }
 0x73e   :  { %1831 = vtanh.f32 %v2418_v9 }
 0x743   :  { %v773_v19 = vpop.permute.xlu0 %772 }
 0x744   :  { %v1832_v3 = vpop.eup %1831  ;;  %v775_v24 = vsel %vm248_vm9, %v771_v53, %v773_v19 }
 0x745   :  { %v779_v5 = vadd.f32 %v775_v24, %v2184_v27  ;;  %734 = vrot.lane.b32.xlu1 %v1832_v3, %s2098_s25 }
 0x747   :  { %1833 = vtanh.f32 %v779_v5  ;;  %v1719_v21 = vmul.f32 -1.442695, %v779_v5 }
 0x749   :  { %1835 = vpow2.f32 %v1719_v21 }
 0x74d   :  { %v1834_v17 = vpop.eup %1833 }
 0x74e   :  { %v820_v20 = vmul.f32 %v1834_v17, %v801_v18 }
 0x74f   :  { %v1836_v25 = vpop.eup %1835 }
 0x750   :  { %822 = vrot.lane.b32.xlu2 %v820_v20, %s2094_s4  ;;  %v787_v26 = vadd.f32 1.0, %v1836_v25 }
 0x752   :  { %1837 = vrcp.f32 %v787_v26  ;;  %v814_v35 = vand.u32 2147483648, %v787_v26  ;;  %vm808_vm15 = vweird.f32 %v787_v26  ;;  %v812_v37 = vand.u32 2147483647, %v787_v26 }
 0x754   :  { %v815_v39 = vor.u32 1.1754944e-38, %v814_v35  ;;  %vm813_vm1 = vcmp.eq.f32.partialorder %v812_v37, 8.507059e+37 }
 0x758   :  { %v1838_v28 = vpop.eup %1837 }
 0x759   :  { %v804_v29 = vmul.f32 %v1838_v28, %v787_v26  ;;  %vm809_vm14 = vweird.f32 %v1838_v28 }
 0x75a   :  { %vm810_vm0 = vmor %vm808_vm15, %vm809_vm14 }
 0x75b   :  { %v805_v30 = vsub.f32 1.0, %v804_v29 }
 0x75d   :  { %v806_v31 = vmul.f32 %v1838_v28, %v805_v30 }
 0x75f   :  { %v807_v34 = vadd.f32 %v1838_v28, %v806_v31 }
 0x761   :  { %v811_v38 = vsel %vm810_vm0, %v1838_v28, %v807_v34 }
 0x762   :  { %v816_v60 = vsel %vm813_vm1, %v815_v39, %v811_v38 }
 0x7aa   :  { %v823_v32 = vpop.permute.xlu2 %822 }
 0x7ab   :  { %v2426_v33 = vadd.f32 %v823_v32, %v819_v1 }
 0x7ad   :  { %1839 = vtanh.f32 %v2426_v33 }
 0x7b3   :  { %v1840_v53 = vpop.eup %1839 }
 0x7b4   :  { %v827_v63 = vmul.f32 %v1840_v53, %v816_v60 }
 0x7b6   :  { %1721 = vmatmul.msk.f32.vlgmr.msrb.gmra.mxu0 %vm248_vm9, %v827_v63  ;;  %1722 = vmatmul.msk.f32.vlgmr.msra.gmra.mxu1 %vm248_vm9, %v827_v63 }
 0x7b7   :  { %v735_v61 = vpop.permute.xlu1 %734  ;;  %1229 = vmatpush.msra.mxu1 %v2431_v0  ;;  %1344 = vmatpush.msrb.mxu0 %v2434_v2 }
 0x7b8   :  { %v2438_v4 = vmul.f32 %v735_v61, %v2409_v36 }
 0x7b9   :  { %1230 = vmatpush.msra.mxu1 %v2440_v6  ;;  %1345 = vmatpush.msrb.mxu0 %v2443_v7 }
 0x7ba   :  { %741 = vrot.lane.b32.xlu0 %v2438_v4, %s2096_s23 }
 0x7bb   :  { %1231 = vmatpush.msra.mxu1 %v2192_v40  ;;  %v2468_v40 = vld [vmem:[#allocation7 + $0xb8] sm:$0xff] }
 0x7bd   :  { %1232 = vmatpush.msra.mxu1 %v2201_v43  ;;  %v2471_v43 = vld [vmem:[#allocation7 + $0xa0] sm:$0xff] }
 0x7bf   :  { %1233 = vmatpush.msra.mxu1 %v2210_v46 }
 0x7c1   :  { %1234 = vmatpush.msra.mxu1 %v2217_v49 }
 0x7c3   :  { %1235 = vmatpush.msra.mxu1 %v2227_v54 }
 0x7c5   :  { %1236 = vmatpush.msra.mxu1 %v2237_v57 }
 0x82c   :  { %v742_v36 = vpop.permute.xlu0 %741 }
 0x82d   :  { %1717 = vmatmul.msk.f32.vlgmr.msra.gmra.mxu2 %vm174_vm6, %v742_v36 }
 0x82e   :  { %1054 = vmatpush.msra.mxu2 %v2455_v8 }
 0x830   :  { %1055 = vmatpush.msra.mxu2 %v2458_v62 }
 0x832   :  { %1056 = vmatpush.msra.mxu2 %v2194_v41 }
 0x833   :  { %v888_v24 = vpop.f32.mrf.mxu1 }
 0x834   :  { %1057 = vmatpush.msra.mxu2 %v2203_v44 }
 0x835   :  { %1720 = vmatmul.msk.f32.vlgmr.msrb.gmra.mxu2 %vm248_vm9, %v827_v63 }
 0x836   :  { %1058 = vmatpush.msra.mxu2 %v2212_v47 }
 0x838   :  { %1059 = vmatpush.msra.mxu2 %v2221_v51 }
 0x83a   :  { %1060 = vmatpush.msra.mxu2 %v2230_v55 }
 0x83c   :  { %1061 = vmatpush.msra.mxu2 %v2240_v58 }
 0x83e   :  { %1269 = vmatpush.msrb.mxu2 %v2468_v40 }
 0x840   :  { %1270 = vmatpush.msrb.mxu2 %v2471_v43 }
 0x842   :  { %1271 = vmatpush.msrb.mxu2 %v2196_v42  ;;  %v868_v42 = vpop.f32.mrf.mxu0 }
 0x844   :  { %1272 = vmatpush.msrb.mxu2 %v2205_v45 }
 0x846   :  { %1273 = vmatpush.msrb.mxu2 %v2214_v48 }
 0x848   :  { %1274 = vmatpush.msrb.mxu2 %v2223_v52 }
 0x84a   :  { %1275 = vmatpush.msrb.mxu2 %v2232_v56 }
 0x84c   :  { %1276 = vmatpush.msrb.mxu2 %v2242_v59 }
 0x8b0   :  { %v762_v41 = vpop.f32.mrf.mxu2 }
 0x8b8   :  { %v848_v44 = vpop.f32.mrf.mxu2 }
 0x8b9   :  { %v891_v46 = vadd.f32 %v848_v44, %v762_v41  ;;  %963 = vrot.lane.b32.xlu0 %v848_v44, %s2094_s4 }
 0x8bb   :  { %v892_v47 = vadd.f32 %v2298_v22, %v891_v46 }
 0x8bd   :  { %1841 = vtanh.f32 %v892_v47  ;;  %v1723_v45 = vmul.f32 -1.442695, %v892_v47 }
 0x8bf   :  { %1843 = vpow2.f32 %v1723_v45 }
 0x8c3   :  { %v1842_v49 = vpop.eup %1841 }
 0x8c4   :  { %915 = vrot.lane.b32.xlu1 %v1842_v49, %s2096_s23 }
 0x8c5   :  { %v1844_v48 = vpop.eup %1843 }
 0x8c6   :  { %v896_v51 = vadd.f32 1.0, %v1844_v48 }
 0x8c8   :  { %1845 = vrcp.f32 %v896_v51  ;;  %v908_v58 = vand.u32 2147483648, %v896_v51  ;;  %vm902_vm3 = vweird.f32 %v896_v51  ;;  %v906_v59 = vand.u32 2147483647, %v896_v51 }
 0x8ca   :  { %v909_v10 = vor.u32 1.1754944e-38, %v908_v58  ;;  %vm907_vm5 = vcmp.eq.f32.partialorder %v906_v59, 8.507059e+37 }
 0x8cc   :  { %965 = vrot.lane.b32.xlu1 %v868_v42, %s2094_s4 }
 0x8ce   :  { %v1846_v52 = vpop.eup %1845 }
 0x8cf   :  { %v898_v54 = vmul.f32 %v1846_v52, %v896_v51  ;;  %vm903_vm2 = vweird.f32 %v1846_v52 }
 0x8d0   :  { %vm904_vm4 = vmor %vm902_vm3, %vm903_vm2 }
 0x8d1   :  { %v899_v55 = vsub.f32 1.0, %v898_v54 }
 0x8d3   :  { %v900_v56 = vmul.f32 %v1846_v52, %v899_v55 }
 0x8d5   :  { %v901_v57 = vadd.f32 %v1846_v52, %v900_v56 }
 0x8d7   :  { %v905_v22 = vsel %vm904_vm4, %v1846_v52, %v901_v57 }
 0x8d8   :  { %v910_v19 = vsel %vm907_vm5, %v909_v10, %v905_v22  ;;  %v2513_v10 = vld [vmem:[#allocation7 + $0x60] sm:$0xff] }
 0x8d9   :  { %v913_v20 = vmul.f32 %v910_v19, %v2418_v9 }
 0x92b   :  { %v964_v13 = vpop.permute.xlu0 %963 }
 0x936   :  { %v916_v11 = vpop.permute.xlu1 %915 }
 0x937   :  { %v918_v3 = vmul.f32 %v916_v11, %v910_v19  ;;  %v2516_v11 = vld [vmem:[#allocation7 + $0x48] sm:$0xff] }
 0x939   :  { %920 = vrot.lane.b32.xlu2 %v918_v3, %s2097_s24 }
 0x93e   :  { %v966_v5 = vpop.permute.xlu1 %965 }
 0x93f   :  { %v969_v23 = vsel %vm248_vm9, %v964_v13, %v966_v5  ;;  %v2538_v13 = vld [vmem:[#allocation7 + $0x50] sm:$0xff] }
 0x940   :  { %v973_v14 = vadd.f32 %v969_v23, %v2153_v12  ;;  %v2541_v23 = vld [vmem:[#allocation7 + $0x38] sm:$0xff] }
 0x941   :  { %967 = vrot.lane.b32.xlu2 %v888_v24, %s2094_s4  ;;  %v2531_v24 = vld [vmem:[#allocation7 + $0x80] sm:$0xff] }
 0x942   :  { %v1725_v15 = vmul.f32 -1.442695, %v973_v14  ;;  %v2544_v14 = vld [vmem:[#allocation7 + $0x20] sm:$0xff] }
 0x944   :  { %1847 = vpow2.f32 %v1725_v15  ;;  %v2547_v15 = vld [vmem:[#allocation7 + $0x8] sm:$0xff] }
 0x94a   :  { %v1848_v16 = vpop.eup %1847 }
 0x94b   :  { %v981_v17 = vadd.f32 1.0, %v1848_v16  ;;  %v1949_v16 = vld [vmem:[#allocation7 + $0x88] sm:$0xff] }
 0x94d   :  { %1849 = vrcp.f32 %v981_v17  ;;  %v994_v9 = vand.u32 2147483648, %v981_v17  ;;  %vm988_vm8 = vweird.f32 %v981_v17  ;;  %v992_v35 = vand.u32 2147483647, %v981_v17 }
 0x94f   :  { %v995_v38 = vor.u32 1.1754944e-38, %v994_v9  ;;  %vm993_vm11 = vcmp.eq.f32.partialorder %v992_v35, 8.507059e+37 }
 0x953   :  { %v1850_v18 = vpop.eup %1849 }
 0x954   :  { %v984_v21 = vmul.f32 %v1850_v18, %v981_v17  ;;  %vm989_vm7 = vweird.f32 %v1850_v18  ;;  %v1950_v17 = vld [vmem:[#allocation7 + $0x70] sm:$0xff] }
 0x955   :  { %vm990_vm10 = vmor %vm988_vm8, %vm989_vm7 }
 0x956   :  { %v985_v28 = vsub.f32 1.0, %v984_v21  ;;  %v1953_v21 = vld [vmem:[#allocation7 + $0x28] sm:$0xff] }
 0x958   :  { %v986_v29 = vmul.f32 %v1850_v18, %v985_v28 }
 0x95a   :  { %v987_v34 = vadd.f32 %v1850_v18, %v986_v29 }
 0x95c   :  { %v991_v37 = vsel %vm990_vm10, %v1850_v18, %v987_v34  ;;  %v1951_v18 = vld [vmem:[#allocation7 + $0x58] sm:$0xff] }
 0x95d   :  { %v996_v53 = vsel %vm993_vm11, %v995_v38, %v991_v37 }
 0x95e   :  { %v1014_v45 = vmul.f32 %v996_v53, %v2426_v33  ;;  %v2510_v33 = vld [vmem:[#allocation7 + $0x78] sm:$0xff] }
 0x993   :  { %v921_v25 = vpop.permute.xlu2 %920 }
 0x994   :  { %v2489_v26 = vadd.f32 %v921_v25, %v913_v20  ;;  %v1952_v20 = vld [vmem:[#allocation7 + $0x40] sm:$0xff]  ;;  %v1954_v25 = vld [vmem:[#allocation7 + $0x10] sm:$0xff] }
 0x996   :  { %1851 = vtanh.f32 %v2489_v26 }
 0x99b   :  { %v968_v30 = vpop.permute.xlu2 %967 }
 0x99c   :  { %v1852_v31 = vpop.eup %1851  ;;  %v970_v1 = vsel %vm248_vm9, %v966_v5, %v968_v30  ;;  %v2534_v5 = vld [vmem:[#allocation7 + $0x68] sm:$0xff] }
 0x99d   :  { %v974_v32 = vadd.f32 %v970_v1, %v2184_v27  ;;  %926 = vrot.lane.b32.xlu0 %v1852_v31, %s2098_s25 }
 0x99f   :  { %1853 = vtanh.f32 %v974_v32  ;;  %v1726_v63 = vmul.f32 -1.442695, %v974_v32 }
 0x9a1   :  { %1855 = vpow2.f32 %v1726_v63 }
 0x9a5   :  { %v1854_v39 = vpop.eup %1853 }
 0x9a6   :  { %v1015_v60 = vmul.f32 %v1854_v39, %v996_v53 }
 0x9a7   :  { %v1856_v61 = vpop.eup %1855 }
 0x9a8   :  { %1017 = vrot.lane.b32.xlu1 %v1015_v60, %s2094_s4  ;;  %v982_v36 = vadd.f32 1.0, %v1856_v61 }
 0x9aa   :  { %1857 = vrcp.f32 %v982_v36  ;;  %v1009_v54 = vand.u32 2147483648, %v982_v36  ;;  %vm1003_vm13 = vweird.f32 %v982_v36  ;;  %v1007_v55 = vand.u32 2147483647, %v982_v36 }
 0x9ac   :  { %v1010_v57 = vor.u32 1.1754944e-38, %v1009_v54  ;;  %vm1008_vm15 = vcmp.eq.f32.partialorder %v1007_v55, 8.507059e+37 }
 0x9b0   :  { %v1858_v41 = vpop.eup %1857 }
 0x9b1   :  { %v999_v46 = vmul.f32 %v1858_v41, %v982_v36  ;;  %vm1004_vm12 = vweird.f32 %v1858_v41 }
 0x9b2   :  { %vm1005_vm14 = vmor %vm1003_vm13, %vm1004_vm12 }
 0x9b3   :  { %v1000_v49 = vsub.f32 1.0, %v999_v46 }
 0x9b5   :  { %v1001_v42 = vmul.f32 %v1858_v41, %v1000_v49 }
 0x9b7   :  { %v1002_v52 = vadd.f32 %v1858_v41, %v1001_v42 }
 0x9b9   :  { %v1006_v56 = vsel %vm1005_vm14, %v1858_v41, %v1002_v52 }
 0x9ba   :  { %v1011_v59 = vsel %vm1008_vm15, %v1010_v57, %v1006_v56 }
 0xa0f   :  { %v927_v44 = vpop.permute.xlu0 %926 }
 0xa10   :  { %v2496_v47 = vmul.f32 %v927_v44, %v910_v19  ;;  %v2519_v19 = vld [vmem:[#allocation7 + $0x30] sm:$0xff] }
 0xa12   :  { %936 = vrot.lane.b32.xlu2 %v2496_v47, %s2096_s23 }
 0xa1a   :  { %v1018_v48 = vpop.permute.xlu1 %1017 }
 0xa1b   :  { %v2501_v51 = vadd.f32 %v1018_v48, %v1014_v45 }
 0xa1d   :  { %1859 = vtanh.f32 %v2501_v51 }
 0xa23   :  { %v1860_v58 = vpop.eup %1859 }
 0xa24   :  { %v1022_v22 = vmul.f32 %v1860_v58, %v1011_v59 }
 0xa26   :  { %1728 = vmatmul.msk.f32.vlgmr.msra.gmra.mxu2 %vm248_vm9, %v1022_v22  ;;  %1729 = vmatmul.msk.f32.vlgmr.msra.gmra.mxu0 %vm248_vm9, %v1022_v22 }
 0xa27   :  { %1424 = vmatpush.msra.mxu0 %v2431_v0  ;;  %1539 = vmatpush.msra.mxu2 %v2434_v2  ;;  %v2522_v2 = vld [vmem:[#allocation7 + $0x18] sm:$0xff] }
 0xa29   :  { %1425 = vmatpush.msra.mxu0 %v2440_v6  ;;  %1540 = vmatpush.msra.mxu2 %v2443_v7  ;;  %v2525_v7 = vld [vmem:[#allocation7] sm:$0xff] }
 0xa2b   :  { %1426 = vmatpush.msra.mxu0 %v2510_v33 }
 0xa2d   :  { %1427 = vmatpush.msra.mxu0 %v2513_v10 }
 0xa2f   :  { %1428 = vmatpush.msra.mxu0 %v2516_v11 }
 0xa31   :  { %1429 = vmatpush.msra.mxu0 %v2519_v19 }
 0xa33   :  { %1430 = vmatpush.msra.mxu0 %v2522_v2 }
 0xa35   :  { %1431 = vmatpush.msra.mxu0 %v2525_v7 }
 0xa6c   :  { %v937_v3 = vpop.permute.xlu2 %936 }
 0xa6d   :  { %1724 = vmatmul.msk.f32.vlgmr.msrb.gmra.mxu3 %vm174_vm6, %v937_v3 }
 0xa6e   :  { %1249 = vmatpush.msrb.mxu3 %v2455_v8 }
 0xa70   :  { %1250 = vmatpush.msrb.mxu3 %v2458_v62 }
 0xa72   :  { %1251 = vmatpush.msrb.mxu3 %v2531_v24 }
 0xa74   :  { %1252 = vmatpush.msrb.mxu3 %v2534_v5 }
 0xa75   :  { %1727 = vmatmul.msk.f32.vlgmr.msra.gmra.mxu3 %vm248_vm9, %v1022_v22 }
 0xa76   :  { %1253 = vmatpush.msrb.mxu3 %v2538_v13 }
 0xa78   :  { %1254 = vmatpush.msrb.mxu3 %v2541_v23 }
 0xa7a   :  { %1255 = vmatpush.msrb.mxu3 %v2544_v14 }
 0xa7c   :  { %1256 = vmatpush.msrb.mxu3 %v2547_v15 }
 0xa7e   :  { %1464 = vmatpush.msra.mxu3 %v2468_v40  ;;  %v2556_v40 = vld [vmem:[%s2680_s5] ss:$0 sm:$0xff]  ;;  %s2099_s5 = smov 48  }
 0xa80   :  { %1465 = vmatpush.msra.mxu3 %v2471_v43 }
 0xa82   :  { %1466 = vmatpush.msra.mxu3 %v1949_v16 }
 0xa84   :  { %1467 = vmatpush.msra.mxu3 %v1950_v17 }
 0xa86   :  { %1468 = vmatpush.msra.mxu3 %v1951_v18 }
 0xa88   :  { %1469 = vmatpush.msra.mxu3 %v1952_v20 }
 0xa8a   :  { %1470 = vmatpush.msra.mxu3 %v1953_v21 }
 0xa8c   :  { %1471 = vmatpush.msra.mxu3 %v1954_v25 }
 0xaa3   :  { %v1083_v49 = vpop.f32.mrf.mxu0 }
 0xaa9   :  { %v1063_v1 = vpop.f32.mrf.mxu2 }
 0xaf0   :  { %v957_v28 = vpop.f32.mrf.mxu3 }
 0xaf8   :  { %v1043_v29 = vpop.f32.mrf.mxu3 }
 0xaf9   :  { %v1086_v30 = vadd.f32 %v1043_v29, %v957_v28  ;;  %1158 = vrot.lane.b32.xlu2 %v1043_v29, %s2094_s4 }
 0xafb   :  { %v1087_v43 = vadd.f32 %v2556_v40, %v1086_v30 }
 0xafd   :  { %1861 = vtanh.f32 %v1087_v43  ;;  %v1730_v32 = vmul.f32 -1.442695, %v1087_v43 }
 0xaff   :  { %1863 = vpow2.f32 %v1730_v32 }
 0xb03   :  { %v1862_v31 = vpop.eup %1861 }
 0xb04   :  { %1110 = vrot.lane.b32.xlu0 %v1862_v31, %s2096_s23 }
 0xb05   :  { %v1864_v34 = vpop.eup %1863 }
 0xb06   :  { %v1091_v9 = vadd.f32 1.0, %v1864_v34 }
 0xb08   :  { %1865 = vrcp.f32 %v1091_v9  ;;  %v1103_v60 = vand.u32 2147483648, %v1091_v9  ;;  %vm1097_vm1 = vweird.f32 %v1091_v9  ;;  %v1101_v63 = vand.u32 2147483647, %v1091_v9 }
 0xb0a   :  { %v1104_v36 = vor.u32 1.1754944e-38, %v1103_v60  ;;  %vm1102_vm3 = vcmp.eq.f32.partialorder %v1101_v63, 8.507059e+37 }
 0xb0c   :  { %1160 = vrot.lane.b32.xlu0 %v1063_v1, %s2094_s4 }
 0xb0e   :  { %v1866_v35 = vpop.eup %1865 }
 0xb0f   :  { %v1093_v37 = vmul.f32 %v1866_v35, %v1091_v9  ;;  %vm1098_vm0 = vweird.f32 %v1866_v35 }
 0xb10   :  { %vm1099_vm2 = vmor %vm1097_vm1, %vm1098_vm0 }
 0xb11   :  { %v1094_v38 = vsub.f32 1.0, %v1093_v37 }
 0xb13   :  { %v1095_v39 = vmul.f32 %v1866_v35, %v1094_v38 }
 0xb15   :  { %v1096_v53 = vadd.f32 %v1866_v35, %v1095_v39 }
 0xb17   :  { %v1100_v61 = vsel %vm1099_vm2, %v1866_v35, %v1096_v53 }
 0xb18   :  { %v1105_v44 = vsel %vm1102_vm3, %v1104_v36, %v1100_v61 }
 0xb19   :  { %v1108_v58 = vmul.f32 %v1105_v44, %v2489_v26 }
 0xb53   :  { %v1159_v45 = vpop.permute.xlu2 %1158 }
 0xb76   :  { %v1111_v41 = vpop.permute.xlu0 %1110 }
 0xb77   :  { %v1113_v46 = vmul.f32 %v1111_v41, %v1105_v44 }
 0xb79   :  { %1115 = vrot.lane.b32.xlu1 %v1113_v46, %s2097_s24 }
 0xb7e   :  { %v1161_v42 = vpop.permute.xlu0 %1160 }
 0xb7f   :  { %v1164_v48 = vsel %vm248_vm9, %v1159_v45, %v1161_v42 }
 0xb80   :  { %v1168_v52 = vadd.f32 %v1164_v48, %v2153_v12 }
 0xb81   :  { %1162 = vrot.lane.b32.xlu1 %v1083_v49, %s2094_s4 }
 0xb82   :  { %v1732_v54 = vmul.f32 -1.442695, %v1168_v52 }
 0xb84   :  { %1867 = vpow2.f32 %v1732_v54 }
 0xb8a   :  { %v1868_v55 = vpop.eup %1867 }
 0xb8b   :  { %v1176_v56 = vadd.f32 1.0, %v1868_v55 }
 0xb8d   :  { %1869 = vrcp.f32 %v1176_v56  ;;  %v1189_v26 = vand.u32 2147483648, %v1176_v56  ;;  %vm1183_vm5 = vweird.f32 %v1176_v56  ;;  %v1187_v29 = vand.u32 2147483647, %v1176_v56 }
 0xb8f   :  { %v1190_v43 = vor.u32 1.1754944e-38, %v1189_v26  ;;  %vm1188_vm8 = vcmp.eq.f32.partialorder %v1187_v29, 8.507059e+37 }
 0xb93   :  { %v1870_v57 = vpop.eup %1869 }
 0xb94   :  { %v1179_v59 = vmul.f32 %v1870_v57, %v1176_v56  ;;  %vm1184_vm4 = vweird.f32 %v1870_v57 }
 0xb95   :  { %vm1185_vm7 = vmor %vm1183_vm5, %vm1184_vm4 }
 0xb96   :  { %v1180_v16 = vsub.f32 1.0, %v1179_v59 }
 0xb98   :  { %v1181_v17 = vmul.f32 %v1870_v57, %v1180_v16 }
 0xb9a   :  { %v1182_v28 = vadd.f32 %v1870_v57, %v1181_v17 }
 0xb9c   :  { %v1186_v30 = vsel %vm1185_vm7, %v1870_v57, %v1182_v28 }
 0xb9d   :  { %v1191_v1 = vsel %vm1188_vm8, %v1190_v43, %v1186_v30 }
 0xb9e   :  { %v1209_v61 = vmul.f32 %v1191_v1, %v2501_v51 }
 0xbeb   :  { %v1116_v22 = vpop.permute.xlu1 %1115 }
 0xbec   :  { %v2566_v3 = vadd.f32 %v1116_v22, %v1108_v58 }
 0xbee   :  { %1871 = vtanh.f32 %v2566_v3 }
 0xbf3   :  { %v1163_v18 = vpop.permute.xlu1 %1162 }
 0xbf4   :  { %v1872_v20 = vpop.eup %1871  ;;  %v1165_v21 = vsel %vm248_vm9, %v1161_v42, %v1163_v18 }
 0xbf5   :  { %v1169_v25 = vadd.f32 %v1165_v21, %v2184_v27  ;;  %1121 = vrot.lane.b32.xlu2 %v1872_v20, %s2098_s25 }
 0xbf7   :  { %1873 = vtanh.f32 %v1169_v25  ;;  %v1733_v34 = vmul.f32 -1.442695, %v1169_v25 }
 0xbf9   :  { %1875 = vpow2.f32 %v1733_v34 }
 0xbfd   :  { %v1874_v31 = vpop.eup %1873 }
 0xbfe   :  { %v1210_v32 = vmul.f32 %v1874_v31, %v1191_v1 }
 0xbff   :  { %v1876_v37 = vpop.eup %1875 }
 0xc00   :  { %1212 = vrot.lane.b32.xlu0 %v1210_v32, %s2094_s4  ;;  %v1177_v38 = vadd.f32 1.0, %v1876_v37 }
 0xc02   :  { %1877 = vrcp.f32 %v1177_v38  ;;  %vm1198_vm11 = vweird.f32 %v1177_v38  ;;  %v1202_v49 = vand.u32 2147483647, %v1177_v38 }
 0xc04   :  { %vm1203_vm13 = vcmp.eq.f32.partialorder %v1202_v49, 8.507059e+37 }
 0xc08   :  { %v1878_v39 = vpop.eup %1877 }
 0xc09   :  { %v1194_v53 = vmul.f32 %v1878_v39, %v1177_v38  ;;  %vm1199_vm10 = vweird.f32 %v1878_v39 }
 0xc0a   :  { %vm1200_vm12 = vmor %vm1198_vm11, %vm1199_vm10 }
 0xc0b   :  { %v1195_v60 = vsub.f32 1.0, %v1194_v53 }
 0xc0d   :  { %v1196_v63 = vmul.f32 %v1878_v39, %v1195_v60 }
 0xc0f   :  { %v1197_v46 = vadd.f32 %v1878_v39, %v1196_v63 }
 0xc11   :  { %v1201_v42 = vsel %vm1200_vm12, %v1878_v39, %v1197_v46 }
 0xc4f   :  { %v1122_v9 = vpop.permute.xlu2 %1121 }
 0xc50   :  { %v2573_v35 = vmul.f32 %v1122_v9, %v1105_v44  ;;  %v1204_v44 = vand.u32 2147483648, %v1177_v38 }
 0xc52   :  { %1131 = vrot.lane.b32.xlu1 %v2573_v35, %s2096_s23  ;;  %v1205_v45 = vor.u32 1.1754944e-38, %v1204_v44 }
 0xc54   :  { %v1206_v52 = vsel %vm1203_vm13, %v1205_v45, %v1201_v42 }
 0xc72   :  { %v1213_v36 = vpop.permute.xlu0 %1212 }
 0xc73   :  { %v2578_v41 = vadd.f32 %v1213_v36, %v1209_v61 }
 0xc75   :  { %1879 = vtanh.f32 %v2578_v41 }
 0xc7b   :  { %v1880_v48 = vpop.eup %1879 }
 0xc7c   :  { %v1217_v54 = vmul.f32 %v1880_v48, %v1206_v52 }
 0xc7e   :  { %1735 = vmatmul.msk.f32.vlgmr.msrb.gmra.mxu3 %vm248_vm9, %v1217_v54  ;;  %1736 = vmatmul.msk.f32.vlgmr.msrb.gmra.mxu2 %vm248_vm9, %v1217_v54 }
 0xc7f   :  { %1619 = vmatpush.msrb.mxu2 %v2431_v0 }
 0xc81   :  { %1620 = vmatpush.msrb.mxu2 %v2440_v6 }
 0xc83   :  { %1621 = vmatpush.msrb.mxu2 %v2510_v33 }
 0xc85   :  { %1622 = vmatpush.msrb.mxu2 %v2513_v10 }
 0xc87   :  { %1623 = vmatpush.msrb.mxu2 %v2516_v11 }
 0xc89   :  { %1624 = vmatpush.msrb.mxu2 %v2519_v19 }
 0xc8b   :  { %1625 = vmatpush.msrb.mxu2 %v2522_v2 }
 0xc8d   :  { %1626 = vmatpush.msrb.mxu2 %v2525_v7 }
 0xcc4   :  { %v1132_v51 = vpop.permute.xlu1 %1131 }
 0xcc5   :  { %1731 = vmatmul.msk.f32.vlgmr.msrb.gmra.mxu1 %vm174_vm6, %v1132_v51 }
 0xcc6   :  { %1444 = vmatpush.msrb.mxu1 %v2455_v8 }
 0xcc8   :  { %1445 = vmatpush.msrb.mxu1 %v2458_v62 }
 0xcca   :  { %1446 = vmatpush.msrb.mxu1 %v2531_v24 }
 0xccc   :  { %1447 = vmatpush.msrb.mxu1 %v2534_v5 }
 0xccd   :  { %1734 = vmatmul.msk.f32.vlgmr.msra.gmra.mxu1 %vm248_vm9, %v1217_v54 }
 0xcce   :  { %1448 = vmatpush.msrb.mxu1 %v2538_v13 }
 0xcd0   :  { %1449 = vmatpush.msrb.mxu1 %v2541_v23 }
 0xcd2   :  { %1450 = vmatpush.msrb.mxu1 %v2544_v14 }
 0xcd4   :  { %1451 = vmatpush.msrb.mxu1 %v2547_v15 }
 0xd01   :  { %v1258_v10 = vpop.f32.mrf.mxu3  ;;  %v1278_v22 = vpop.f32.mrf.mxu2 }
 0xd42   :  { %v1152_v0 = vpop.f32.mrf.mxu1 }
 0xd4a   :  { %v1238_v6 = vpop.f32.mrf.mxu1 }
 0xd4b   :  { %v1281_v33 = vadd.f32 %v1238_v6, %v1152_v0  ;;  %1353 = vrot.lane.b32.xlu1 %v1238_v6, %s2094_s4 }
 0xd4d   :  { %v1282_v8 = vadd.f32 %v2556_v40, %v1281_v33 }
 0xd4f   :  { %1881 = vtanh.f32 %v1282_v8  ;;  %v1737_v11 = vmul.f32 -1.442695, %v1282_v8 }
 0xd51   :  { %1883 = vpow2.f32 %v1737_v11 }
 0xd55   :  { %v1882_v62 = vpop.eup %1881 }
 0xd56   :  { %1305 = vrot.lane.b32.xlu2 %v1882_v62, %s2096_s23 }
 0xd57   :  { %v1884_v19 = vpop.eup %1883 }
 0xd58   :  { %v1286_v2 = vadd.f32 1.0, %v1884_v19 }
 0xd5a   :  { %1885 = vrcp.f32 %v1286_v2  ;;  %v1298_v14 = vand.u32 2147483648, %v1286_v2  ;;  %vm1292_vm15 = vweird.f32 %v1286_v2  ;;  %v1296_v15 = vand.u32 2147483647, %v1286_v2 }
 0xd5c   :  { %v1299_v56 = vor.u32 1.1754944e-38, %v1298_v14  ;;  %vm1297_vm1 = vcmp.eq.f32.partialorder %v1296_v15, 8.507059e+37 }
 0xd5e   :  { %1355 = vrot.lane.b32.xlu2 %v1258_v10, %s2094_s4 }
 0xd60   :  { %v1886_v7 = vpop.eup %1885 }
 0xd61   :  { %v1288_v24 = vmul.f32 %v1886_v7, %v1286_v2  ;;  %vm1293_vm14 = vweird.f32 %v1886_v7 }
 0xd62   :  { %vm1294_vm0 = vmor %vm1292_vm15, %vm1293_vm14 }
 0xd63   :  { %v1289_v5 = vsub.f32 1.0, %v1288_v24 }
 0xd65   :  { %v1290_v13 = vmul.f32 %v1886_v7, %v1289_v5 }
 0xd67   :  { %v1291_v23 = vadd.f32 %v1886_v7, %v1290_v13 }
 0xd69   :  { %v1295_v55 = vsel %vm1294_vm0, %v1886_v7, %v1291_v23 }
 0xd6a   :  { %v2605_v58 = vsel %vm1297_vm1, %v1299_v56, %v1295_v55 }
 0xd6b   :  { %v1303_v29 = vmul.f32 %v2605_v58, %v2566_v3 }
 0xdb0   :  { %v1306_v57 = vpop.permute.xlu2 %1305 }
 0xdb1   :  { %v1308_v59 = vmul.f32 %v1306_v57, %v2605_v58 }
 0xdb3   :  { %1310 = vrot.lane.b32.xlu0 %v1308_v59, %s2097_s24 }
 0xdb8   :  { %v1356_v17 = vpop.permute.xlu2 %1355 }
 0xdbb   :  { %1357 = vrot.lane.b32.xlu0 %v1278_v22, %s2094_s4 }
 0xdbd   :  { %v1354_v16 = vpop.permute.xlu1 %1353 }
 0xdbe   :  { %v1359_v18 = vsel %vm248_vm9, %v1354_v16, %v1356_v17 }
 0xdbf   :  { %v1363_v20 = vadd.f32 %v1359_v18, %v2153_v12 }
 0xdc1   :  { %v1739_v21 = vmul.f32 -1.442695, %v1363_v20 }
 0xdc3   :  { %1887 = vpow2.f32 %v1739_v21 }
 0xdc9   :  { %v1888_v25 = vpop.eup %1887 }
 0xdca   :  { %v1371_v28 = vadd.f32 1.0, %v1888_v25 }
 0xdcc   :  { %1889 = vrcp.f32 %v1371_v28  ;;  %v1384_v3 = vand.u32 2147483648, %v1371_v28  ;;  %vm1378_vm3 = vweird.f32 %v1371_v28  ;;  %v1382_v53 = vand.u32 2147483647, %v1371_v28 }
 0xdce   :  { %v1385_v63 = vor.u32 1.1754944e-38, %v1384_v3  ;;  %vm1383_vm5 = vcmp.eq.f32.partialorder %v1382_v53, 8.507059e+37 }
 0xdd2   :  { %v1890_v26 = vpop.eup %1889 }
 0xdd3   :  { %v1374_v30 = vmul.f32 %v1890_v26, %v1371_v28  ;;  %vm1379_vm2 = vweird.f32 %v1890_v26 }
 0xdd4   :  { %vm1380_vm4 = vmor %vm1378_vm3, %vm1379_vm2 }
 0xdd5   :  { %v1375_v1 = vsub.f32 1.0, %v1374_v30 }
 0xdd7   :  { %v1376_v32 = vmul.f32 %v1890_v26, %v1375_v1 }
 0xdd9   :  { %v1377_v39 = vadd.f32 %v1890_v26, %v1376_v32 }
 0xddb   :  { %v1381_v60 = vsel %vm1380_vm4, %v1890_v26, %v1377_v39 }
 0xddc   :  { %v1386_v36 = vsel %vm1383_vm5, %v1385_v63, %v1381_v60 }
 0xddd   :  { %v1404_v51 = vmul.f32 %v1386_v36, %v2578_v41 }
 0xe25   :  { %v1311_v43 = vpop.permute.xlu0 %1310 }
 0xe26   :  { %v2614_v31 = vadd.f32 %v1311_v43, %v1303_v29 }
 0xe28   :  { %1891 = vtanh.f32 %v2614_v31 }
 0xe2d   :  { %v1358_v34 = vpop.permute.xlu0 %1357 }
 0xe2e   :  { %v1892_v9 = vpop.eup %1891  ;;  %v1360_v37 = vsel %vm248_vm9, %v1356_v17, %v1358_v34 }
 0xe2f   :  { %v1364_v38 = vadd.f32 %v1360_v37, %v2184_v27  ;;  %1316 = vrot.lane.b32.xlu1 %v1892_v9, %s2098_s25 }
 0xe31   :  { %1893 = vtanh.f32 %v1364_v38  ;;  %v1740_v44 = vmul.f32 -1.442695, %v1364_v38 }
 0xe33   :  { %1895 = vpow2.f32 %v1740_v44 }
 0xe37   :  { %v1894_v61 = vpop.eup %1893 }
 0xe38   :  { %v1405_v46 = vmul.f32 %v1894_v61, %v1386_v36 }
 0xe39   :  { %v1896_v49 = vpop.eup %1895 }
 0xe3a   :  { %1407 = vrot.lane.b32.xlu2 %v1405_v46, %s2094_s4  ;;  %v1372_v42 = vadd.f32 1.0, %v1896_v49 }
 0xe3c   :  { %1897 = vrcp.f32 %v1372_v42  ;;  %v1399_v8 = vand.u32 2147483648, %v1372_v42  ;;  %vm1393_vm8 = vweird.f32 %v1372_v42  ;;  %v1397_v62 = vand.u32 2147483647, %v1372_v42 }
 0xe3e   :  { %v1400_v11 = vor.u32 1.1754944e-38, %v1399_v8  ;;  %vm1398_vm11 = vcmp.eq.f32.partialorder %v1397_v62, 8.507059e+37 }
 0xe42   :  { %v1898_v45 = vpop.eup %1897 }
 0xe43   :  { %v1389_v48 = vmul.f32 %v1898_v45, %v1372_v42  ;;  %vm1394_vm7 = vweird.f32 %v1898_v45 }
 0xe44   :  { %vm1395_vm10 = vmor %vm1393_vm8, %vm1394_vm7 }
 0xe45   :  { %v1390_v52 = vsub.f32 1.0, %v1389_v48 }
 0xe47   :  { %v1391_v54 = vmul.f32 %v1898_v45, %v1390_v52 }
 0xe49   :  { %v1392_v33 = vadd.f32 %v1898_v45, %v1391_v54 }
 0xe4b   :  { %v1396_v10 = vsel %vm1395_vm10, %v1898_v45, %v1392_v33 }
 0xe4c   :  { %v1401_v2 = vsel %vm1398_vm11, %v1400_v11, %v1396_v10 }
 0xe94   :  { %v1408_v0 = vpop.permute.xlu2 %1407 }
 0xe95   :  { %v2622_v6 = vadd.f32 %v1408_v0, %v1404_v51 }
 0xe97   :  { %1899 = vtanh.f32 %v2622_v6 }
 0xe9d   :  { %v1900_v19 = vpop.eup %1899 }
 0xe9e   :  { %v1412_v7 = vmul.f32 %v1900_v19, %v1401_v2 }
 0xea0   :  { %1742 = vmatmul.msk.f32.vlgmr.msrb.gmra.mxu1 %vm248_vm9, %v1412_v7  ;;  %1743 = vmatmul.msk.f32.vlgmr.msra.gmra.mxu3 %vm248_vm9, %v1412_v7 }
 0xea1   :  { %v1317_v41 = vpop.permute.xlu1 %1316 }
 0xea2   :  { %v2628_v24 = vmul.f32 %v1317_v41, %v2605_v58 }
 0xea4   :  { %1326 = vrot.lane.b32.xlu0 %v2628_v24, %s2096_s23 }
 0xf16   :  { %v1327_v5 = vpop.permute.xlu0 %1326 }
 0xf17   :  { %1738 = vmatmul.msk.f32.vlgmr.msrb.gmra.mxu0 %vm174_vm6, %v1327_v5 }
 0xf1d   :  { %v1453_v56 = vpop.f32.mrf.mxu1 }
 0xf1f   :  { %1741 = vmatmul.msk.f32.vlgmr.msra.gmra.mxu0 %vm248_vm9, %v1412_v7 }
 0xf23   :  { %v1473_v1 = vpop.f32.mrf.mxu3 }
 0xf94   :  { %v1347_v13 = vpop.f32.mrf.mxu0 }
 0xf9c   :  { %v1433_v23 = vpop.f32.mrf.mxu0 }
 0xf9d   :  { %v1476_v14 = vadd.f32 %v1433_v23, %v1347_v13  ;;  %1548 = vrot.lane.b32.xlu0 %v1433_v23, %s2094_s4 }
 0xf9f   :  { %v1477_v15 = vadd.f32 %v2556_v40, %v1476_v14 }
 0xfa1   :  { %1901 = vtanh.f32 %v1477_v15  ;;  %v1744_v57 = vmul.f32 -1.442695, %v1477_v15 }
 0xfa3   :  { %1903 = vpow2.f32 %v1744_v57 }
 0xfa7   :  { %v1902_v55 = vpop.eup %1901 }
 0xfa8   :  { %1500 = vrot.lane.b32.xlu1 %v1902_v55, %s2096_s23 }
 0xfa9   :  { %v1904_v58 = vpop.eup %1903 }
 0xfaa   :  { %v1481_v59 = vadd.f32 1.0, %v1904_v58 }
 0xfac   :  { %1905 = vrcp.f32 %v1481_v59  ;;  %v1493_v21 = vand.u32 2147483648, %v1481_v59  ;;  %vm1487_vm13 = vweird.f32 %v1481_v59  ;;  %v1491_v25 = vand.u32 2147483647, %v1481_v59 }
 0xfae   :  { %v1494_v26 = vor.u32 1.1754944e-38, %v1493_v21  ;;  %vm1492_vm15 = vcmp.eq.f32.partialorder %v1491_v25, 8.507059e+37 }
 0xfb0   :  { %1550 = vrot.lane.b32.xlu1 %v1453_v56, %s2094_s4 }
 0xfb2   :  { %v1906_v22 = vpop.eup %1905 }
 0xfb3   :  { %v1483_v16 = vmul.f32 %v1906_v22, %v1481_v59  ;;  %vm1488_vm12 = vweird.f32 %v1906_v22 }
 0xfb4   :  { %vm1489_vm14 = vmor %vm1487_vm13, %vm1488_vm12  ;;  %vm547_vm12 = vcmask 261248   ;;  %vm738_vm13 = vcmask 392448  }
 0xfb5   :  { %v1484_v17 = vsub.f32 1.0, %v1483_v16 }
 0xfb7   :  { %v1485_v18 = vmul.f32 %v1906_v22, %v1484_v17 }
 0xfb9   :  { %v1486_v20 = vadd.f32 %v1906_v22, %v1485_v18 }
 0xfbb   :  { %v1490_v28 = vsel %vm1489_vm14, %v1906_v22, %v1486_v20  ;;  %vm934_vm14 = vcmask 523648  }
 0xfbc   :  { %v1495_v30 = vsel %vm1492_vm15, %v1494_v26, %v1490_v28  ;;  %vm1129_vm15 = vcmask 654848  }
 0xfbd   :  { %v1498_v60 = vmul.f32 %v1495_v30, %v2614_v31 }
0x100f   :  { %v1549_v34 = vpop.permute.xlu0 %1548 }
0x101a   :  { %v1501_v29 = vpop.permute.xlu1 %1500 }
0x101b   :  { %v1503_v43 = vmul.f32 %v1501_v29, %v1495_v30 }
0x101d   :  { %1505 = vrot.lane.b32.xlu2 %v1503_v43, %s2097_s24 }
0x1022   :  { %v1551_v32 = vpop.permute.xlu1 %1550 }
0x1023   :  { %v1554_v9 = vsel %vm248_vm9, %v1549_v34, %v1551_v32 }
0x1024   :  { %v1558_v37 = vadd.f32 %v1554_v9, %v2153_v12 }
0x1025   :  { %1552 = vrot.lane.b32.xlu2 %v1473_v1, %s2094_s4 }
0x1026   :  { %v1746_v38 = vmul.f32 -1.442695, %v1558_v37 }
0x1028   :  { %1907 = vpow2.f32 %v1746_v38 }
0x102e   :  { %v1908_v39 = vpop.eup %1907 }
0x102f   :  { %v1566_v3 = vadd.f32 1.0, %v1908_v39 }
0x1031   :  { %1909 = vrcp.f32 %v1566_v3  ;;  %v1579_v31 = vand.u32 2147483648, %v1566_v3  ;;  %vm1573_vm1 = vweird.f32 %v1566_v3  ;;  %v1577_v52 = vand.u32 2147483647, %v1566_v3 }
0x1033   :  { %v1580_v51 = vor.u32 1.1754944e-38, %v1579_v31  ;;  %vm1578_vm3 = vcmp.eq.f32.partialorder %v1577_v52, 8.507059e+37 }
0x1037   :  { %v1910_v53 = vpop.eup %1909 }
0x1038   :  { %v1569_v63 = vmul.f32 %v1910_v53, %v1566_v3  ;;  %vm1574_vm0 = vweird.f32 %v1910_v53 }
0x1039   :  { %vm1575_vm2 = vmor %vm1573_vm1, %vm1574_vm0  ;;  %vm1324_vm0 = vcmask 786048   ;;  %vm1519_vm1 = vcmask 917248  }
0x103a   :  { %v1570_v46 = vsub.f32 1.0, %v1569_v63 }
0x103c   :  { %v1571_v44 = vmul.f32 %v1910_v53, %v1570_v46 }
0x103e   :  { %v1572_v48 = vadd.f32 %v1910_v53, %v1571_v44 }
0x1040   :  { %v1576_v54 = vsel %vm1575_vm2, %v1910_v53, %v1572_v48  ;;  %vm1674_vm2 = vcmask 1048448  }
0x1041   :  { %v1581_v33 = vsel %vm1578_vm3, %v1580_v51, %v1576_v54 }
0x1042   :  { %v1599_v13 = vmul.f32 %v1581_v33, %v2622_v6 }
0x1077   :  { %v1506_v61 = vpop.permute.xlu2 %1505 }
0x1078   :  { %v2643_v36 = vadd.f32 %v1506_v61, %v1498_v60 }
0x107a   :  { %1911 = vtanh.f32 %v2643_v36 }
0x107f   :  { %v1553_v49 = vpop.permute.xlu2 %1552 }
0x1080   :  { %v1912_v42 = vpop.eup %1911  ;;  %v1555_v12 = vsel %vm248_vm9, %v1551_v32, %v1553_v49 }
0x1081   :  { %v1559_v45 = vadd.f32 %v1555_v12, %v2184_v27  ;;  %1511 = vrot.lane.b32.xlu0 %v1912_v42, %s2098_s25 }
0x1083   :  { %1913 = vtanh.f32 %v1559_v45  ;;  %v1747_v27 = vmul.f32 -1.442695, %v1559_v45 }
0x1085   :  { %1915 = vpow2.f32 %v1747_v27 }
0x1089   :  { %v1914_v0 = vpop.eup %1913 }
0x108a   :  { %v1600_v8 = vmul.f32 %v1914_v0, %v1581_v33 }
0x108b   :  { %v1916_v11 = vpop.eup %1915 }
0x108c   :  { %1602 = vrot.lane.b32.xlu1 %v1600_v8, %s2094_s4  ;;  %v1567_v19 = vadd.f32 1.0, %v1916_v11 }
0x108e   :  { %1917 = vrcp.f32 %v1567_v19  ;;  %v1594_v55 = vand.u32 2147483648, %v1567_v19  ;;  %vm1588_vm5 = vweird.f32 %v1567_v19  ;;  %v1592_v57 = vand.u32 2147483647, %v1567_v19 }
0x1090   :  { %v1595_v22 = vor.u32 1.1754944e-38, %v1594_v55  ;;  %vm1593_vm8 = vcmp.eq.f32.partialorder %v1592_v57, 8.507059e+37 }
0x1094   :  { %v1918_v2 = vpop.eup %1917 }
0x1095   :  { %v1584_v7 = vmul.f32 %v1918_v2, %v1567_v19  ;;  %vm1589_vm4 = vweird.f32 %v1918_v2 }
0x1096   :  { %vm1590_vm7 = vmor %vm1588_vm5, %vm1589_vm4 }
0x1097   :  { %v1585_v5 = vsub.f32 1.0, %v1584_v7 }
0x1099   :  { %v1586_v14 = vmul.f32 %v1918_v2, %v1585_v5 }
0x109b   :  { %v1587_v15 = vadd.f32 %v1918_v2, %v1586_v14 }
0x109d   :  { %v1591_v58 = vsel %vm1590_vm7, %v1918_v2, %v1587_v15 }
0x109e   :  { %v1596_v16 = vsel %vm1593_vm8, %v1595_v22, %v1591_v58 }
0x10f3   :  { %v1512_v62 = vpop.permute.xlu0 %1511 }
0x10f4   :  { %v2650_v10 = vmul.f32 %v1512_v62, %v1495_v30 }
0x10f6   :  { %1521 = vrot.lane.b32.xlu2 %v2650_v10, %s2096_s23 }
0x10fe   :  { %v1603_v41 = vpop.permute.xlu1 %1602 }
0x10ff   :  { %v1605_v23 = vadd.f32 %v1603_v41, %v1599_v13 }
0x1101   :  { %1919 = vtanh.f32 %v1605_v23 }
0x1107   :  { %v1920_v59 = vpop.eup %1919 }
0x1108   :  { %v1607_v17 = vmul.f32 %v1920_v59, %v1596_v16 }
0x1150   :  { %v1522_v56 = vpop.permute.xlu2 %1521 }
0x1151   :  { %1745 = vmatmul.msk.f32.vlgmr.msra.gmra.mxu2 %vm174_vm6, %v1522_v56 }
0x1159   :  { %1748 = vmatmul.msk.f32.vlgmr.msrb.gmra.mxu2 %vm248_vm9, %v1607_v17 }
0x11d4   :  { %v1542_v6 = vpop.f32.mrf.mxu2 }
0x11dc   :  { %v1628_v18 = vpop.f32.mrf.mxu2 }
0x11dd   :  { %v1631_v20 = vadd.f32 %v1628_v18, %v1542_v6 }
0x11df   :  { %v1632_v21 = vadd.f32 %v2556_v40, %v1631_v20 }
0x11e1   :  { %1921 = vtanh.f32 %v1632_v21  ;;  %v1749_v28 = vmul.f32 -1.442695, %v1632_v21 }
0x11e3   :  { %1923 = vpow2.f32 %v1749_v28 }
0x11e7   :  { %v1922_v25 = vpop.eup %1921 }
0x11e8   :  { %1655 = vrot.lane.b32.xlu0 %v1922_v25, %s2096_s23 }
0x11e9   :  { %v1924_v26 = vpop.eup %1923 }
0x11ea   :  { %v1636_v29 = vadd.f32 1.0, %v1924_v26 }
0x11ec   :  { %1925 = vrcp.f32 %v1636_v29  ;;  %v1648_v34 = vand.u32 2147483648, %v1636_v29  ;;  %vm1642_vm6 = vweird.f32 %v1636_v29  ;;  %v1646_v9 = vand.u32 2147483647, %v1636_v29 }
0x11ee   :  { %vm1647_vm11 = vcmp.eq.f32.partialorder %v1646_v9, 8.507059e+37 }
0x11f0   :  { %544 = vrot.lane.b32.xlu0 %v2367_v50, %s2097_s24  ;;  %v1649_v50 = vor.u32 1.1754944e-38, %v1648_v34 }
0x11f2   :  { %v1926_v30 = vpop.eup %1925 }
0x11f3   :  { %v1638_v43 = vmul.f32 %v1926_v30, %v1636_v29  ;;  %vm1643_vm9 = vweird.f32 %v1926_v30 }
0x11f4   :  { %vm1644_vm10 = vmor %vm1642_vm6, %vm1643_vm9 }
0x11f5   :  { %v1639_v1 = vsub.f32 1.0, %v1638_v43 }
0x11f7   :  { %v1640_v32 = vmul.f32 %v1926_v30, %v1639_v1 }
0x11f8   :  { %1321 = vrot.lane.b32.xlu0 %v2628_v24, %s2099_s5 }
0x11f9   :  { %v1641_v40 = vadd.f32 %v1926_v30, %v1640_v32 }
0x11fb   :  { %v1645_v37 = vsel %vm1644_vm10, %v1926_v30, %v1641_v40 }
0x11fc   :  { %v1650_v24 = vsel %vm1647_vm11, %v1649_v50, %v1645_v37 }
0x11fd   :  { %v1653_v53 = vmul.f32 %v1650_v24, %v2643_v36 }
0x125a   :  { %v1656_v38 = vpop.permute.xlu0 %1655 }
0x125b   :  { %v1658_v39 = vmul.f32 %v1656_v38, %v1650_v24 }
0x125d   :  { %1660 = vrot.lane.b32.xlu1 %v1658_v39, %s2097_s24 }
0x1262   :  { %v545_v3 = vpop.permute.xlu0 %544 }
0x1263   :  { %548 = vst.msk [vmem:[#allocation10] sm:$0xff] %vm547_vm12, %v545_v3 }
0x1264   :  { %739 = vst.msk [vmem:[#allocation10] sm:$0xff] %vm738_vm13, %v2438_v4 }
0x1265   :  { %931 = vrot.lane.b32.xlu1 %v2496_v47, %s2086_s30  ;;  %s1681_s30 = sshll.u32 %s2101_s29, 4  ;;  %s1682_s30 = int_to_ptr.vmem [resolvable:$true] %s1681_s30 }
0x126a   :  { %v1322_v36 = vpop.permute.xlu0 %1321 }
0x126d   :  { %1516 = vrot.lane.b32.xlu1 %v2650_v10, %s2094_s4 }
0x12cf   :  { %v1661_v60 = vpop.permute.xlu1 %1660 }
0x12d0   :  { %v1663_v63 = vadd.f32 %v1661_v60, %v1653_v53 }
0x12d2   :  { %1927 = vtanh.f32 %v1663_v63 }
0x12d7   :  { %v932_v61 = vpop.permute.xlu1 %931 }
0x12d8   :  { %v1928_v46 = vpop.eup %1927  ;;  %935 = vst.msk [vmem:[#allocation10] sm:$0xff] %vm934_vm14, %v932_v61 }
0x12d9   :  { %1666 = vrot.lane.b32.xlu2 %v1928_v46, %s2098_s25 }
0x12df   :  { %v1517_v49 = vpop.permute.xlu1 %1516 }
0x12e1   :  { %1126 = vrot.lane.b32.xlu2 %v2573_v35, %s2098_s25 }
0x1333   :  { %v1667_v4 = vpop.permute.xlu2 %1666 }
0x1334   :  { %v1669_v44 = vmul.f32 %v1667_v4, %v1650_v24 }
0x1336   :  { %1671 = vrot.lane.b32.xlu2 %v1669_v44, %s2100_s28 }
0x133b   :  { %v1127_v47 = vpop.permute.xlu2 %1126 }
0x133c   :  { %1130 = vst.msk [vmem:[#allocation10] sm:$0xff] %vm1129_vm15, %v1127_v47 }
0x133d   :  { %1325 = vst.msk [vmem:[#allocation10] sm:$0xff] %vm1324_vm0, %v1322_v36 }
0x133e   :  { %1520 = vst.msk [vmem:[#allocation10] sm:$0xff] %vm1519_vm1, %v1517_v49 }
0x1390   :  { %v1672_v35 = vpop.permute.xlu2 %1671 }
0x1391   :  { %1675 = vst.msk [vmem:[#allocation10] sm:$0xff] %vm1674_vm2, %v1672_v35 }
0x1392   :  { %1686 = dma.vmem_to_hbm [thread:$0]  %s1682_s30, 128, %s1684_s9, [#allocation4]  }
0x1393   :  { %2082 = dma.done.wait [#allocation4], 128  }
0x1394   :  { %2083 = vsyncadd [#allocation4], 4294967168 }
0x1395   :  { %1691 = vsyncpa [#allocation3], 1 }
0x1396   :  { %1692 = vsyncpa [#allocation6], 1 }
0x1397   :  { %1693 = vsyncpa [#allocation9], 1 }
0x1398   :  { %1694 = vsyncpa [#allocation4], 1 }

</bundles_post_ra>
